<compile_context>
chip_gen: v7x
topology: tpu7x:2x2x1
jax: 0.10.0
libtpu: 0.0.40
codegen_flags: <defaults>
</compile_context>

<pallas_src>
import math

import jax
import jax.numpy as jnp
from jax.experimental import pallas as pl
from jax.experimental.pallas import tpu as pltpu


def _round_up(v, m):
    return (v + m - 1) // m * m


# ---------------------------------------------------------------------------
# Wrapper-side (one-shot) quantization math, faithful to the PyTorch module.
# ---------------------------------------------------------------------------
def _channel_asym_min_max_quantize(w, bit):
    """_channel_asym_min_max_quantize.apply(weight, bit)."""
    if bit == 0:
        return jnp.zeros_like(w)
    wflat = w.reshape(w.shape[0], -1)
    ch_max = jnp.max(wflat, axis=1)
    ch_min = jnp.min(wflat, axis=1)
    ch_range = ch_max - ch_min
    ch_range = jnp.where(ch_range == 0.0, 1.0, ch_range)
    s_w = (ch_range / float(2 ** bit - 1)).reshape(-1, 1, 1, 1)
    return jnp.round(w / s_w) * s_w


def _bias_asym_min_max_quantize(b, bit):
    """_bias_asym_min_max_quantize.apply(bias, 32)."""
    s_b = (jnp.max(b) - jnp.min(b)) / float(2 ** bit - 1)
    s_b_safe = jnp.where(s_b == 0.0, 1.0, s_b)
    # Zero-range guard: PyTorch would emit NaN/Inf here; keep bias unchanged.
    return jnp.where(s_b == 0.0, b, jnp.round(b / s_b_safe) * s_b_safe)


def _mix_quant_weight(weight, bits, cout):
    """Replicates the alpha_weight one-hot precision mixing of the module."""
    alpha_weight = jnp.full((len(bits), cout), 0.01, dtype=jnp.float32)
    sw = jax.nn.one_hot(jnp.argmax(alpha_weight, axis=0), len(bits),
                        dtype=jnp.float32).T                      # (n_bits, cout)
    mix = jnp.zeros_like(weight)
    for i, bit in enumerate(bits):
        qw = _channel_asym_min_max_quantize(weight, bit)
        mix = mix + qw * sw[i].reshape(cout, 1, 1, 1)
    return mix


# ---------------------------------------------------------------------------
# Fused im2col + matmul Pallas kernel.
#   x_ref : (Hp, Wp, C)      bf16   whole padded image of one batch element
#   w_ref : (kh, kw, C, Np)  bf16   quantized weight (resident)
#   b_ref : (1, Np)          f32    quantized bias   (resident)
#   o_ref : (TM, Np)         f32    TM = toh * wo output rows of this tile
# For each kernel tap (i, j) the shifted input window is read straight out of
# the resident VMEM image and accumulated with an MXU matmul; no patch matrix
# ever touches HBM.
# ---------------------------------------------------------------------------
def _make_fused_conv_kernel(kh, kw, stride, toh, wo):
    def kernel(x_ref, w_ref, b_ref, o_ref):
        t = pl.program_id(1)                    # output-row tile index
        row0 = t * (toh * stride)               # base row in the padded image
        c_in = x_ref.shape[-1]
        np_out = o_ref.shape[-1]
        acc = jnp.zeros((toh * wo, np_out), jnp.float32)
        for i in range(kh):
            for j in range(kw):
                if stride == 1:
                    tap = x_ref[pl.ds(row0 + i, toh), pl.ds(j, wo), :]
                else:
                    tap = x_ref[pl.ds(row0 + i, toh, stride=stride),
                                pl.ds(j, wo, stride=stride), :]
                acc = acc + jnp.dot(tap.reshape(toh * wo, c_in),
                                    w_ref[i, j],
                                    preferred_element_type=jnp.float32)
        o_ref[...] = (acc + b_ref[...]).astype(o_ref.dtype)
    return kernel


def _choose_row_tile(n, ho, wo, *, max_rows=2048, min_steps=8):
    """Pick toh | ho with (toh*wo) % 8 == 0 (or toh == ho), favouring >=
    min_steps grid steps for pipeline overlap and <= max_rows rows/tile."""
    divisors = [d for d in range(1, ho + 1) if ho % d == 0]
    valid = [d for d in divisors if d == ho or (d * wo) % 8 == 0]
    if not valid:
        return ho
    good = [d for d in valid if d * wo <= max_rows and n * (ho // d) >= min_steps]
    if good:
        return max(good)
    fits = [d for d in valid if d * wo <= max_rows]
    if fits:
        return max(fits)
    return min(valid)


def _vmem_cap_bytes():
    try:
        info = pltpu.get_tpu_info()
        cap = getattr(info, "vmem_capacity_bytes", None)
        if cap:
            return int(cap)
    except Exception:
        pass
    return 64 * 2 ** 20            # conservative (v7x per-TC) default


def _vmem_need_bytes(hp, wp, c_in, kh, kw, np_out, tm):
    lane = lambda v: _round_up(v, 128)
    x_bytes = hp * _round_up(wp, 16) * lane(c_in) * 2
    w_bytes = kh * kw * _round_up(c_in, 16) * lane(np_out) * 2
    o_bytes = _round_up(tm, 8) * lane(np_out) * 4
    b_bytes = 8 * lane(np_out) * 4
    return 2 * (x_bytes + w_bytes + o_bytes + b_bytes)   # double buffering


# ---------------------------------------------------------------------------
# Public entry point: forward of QuantMultiPrecConv2d.
# ---------------------------------------------------------------------------
def quant_multi_prec_conv2d(x, weight, bias=None, *, bits, stride=1, padding=0,
                            dilation=1, groups=1):
    if isinstance(bits, int):
        bits = [bits]
    # TODO(synk): grouped / dilated convolutions are not implemented.
    assert dilation == 1 and groups == 1, "only groups=1, dilation=1 supported"
    stride, padding = int(stride), int(padding)

    n, c_in, h, w = x.shape
    c_out, _, kh, kw = weight.shape
    ho = (h + 2 * padding - kh) // stride + 1
    wo = (w + 2 * padding - kw) // stride + 1
    hp, wp = h + 2 * padding, w + 2 * padding
    assert ho > 0 and wo > 0

    # ---- one-shot weight / bias quantization (exact, in f32) ----
    wq = _mix_quant_weight(weight.astype(jnp.float32), bits, c_out)
    bq = (_bias_asym_min_max_quantize(bias.astype(jnp.float32), 32)
          if bias is not None else jnp.zeros((c_out,), jnp.float32))

    # ---- bounded output-channel padding (lane-dense only when it pays) ----
    np_out = _round_up(c_out, 128) if c_out >= 128 else c_out

    # (C_out, C_in, kh, kw) -> (kh, kw, C_in, Np), bf16 MXU operand.
    w_hwio = jnp.transpose(wq, (2, 3, 1, 0))
    if np_out != c_out:
        w_hwio = jnp.pad(w_hwio, ((0, 0), (0, 0), (0, 0), (0, np_out - c_out)))
    w_hwio = w_hwio.astype(jnp.bfloat16)
    b_row = jnp.zeros((1, np_out), jnp.float32).at[0, :c_out].set(bq)

    # ---- activation: single NCHW->NHWC transpose + spatial pad + bf16 ----
    xp = jnp.transpose(x, (0, 2, 3, 1))
    if padding:
        xp = jnp.pad(xp, ((0, 0), (padding, padding), (padding, padding), (0, 0)))
    xp = xp.astype(jnp.bfloat16)

    # ---- tiling ----
    toh = _choose_row_tile(n, ho, wo)
    tm = toh * wo
    n_row_tiles = ho // toh
    grid = (n, n_row_tiles)

    need = _vmem_need_bytes(hp, wp, c_in, kh, kw, np_out, tm)
    cap = int(0.75 * _vmem_cap_bytes())
    vmem_limit = int(min(max(2 * need, 16 * 2 ** 20), cap))

    cost = pl.CostEstimate(
        flops=2 * n * ho * wo * kh * kw * c_in * np_out,
        transcendentals=0,
        bytes_accessed=(xp.size * 2 + w_hwio.size * 2 + b_row.size * 4
                        + n * ho * wo * np_out * 4),
    )

    out3d = pl.pallas_call(
        _make_fused_conv_kernel(kh, kw, stride, toh, wo),
        out_shape=jax.ShapeDtypeStruct((n, ho * wo, np_out), jnp.float32),
        grid_spec=pltpu.PrefetchScalarGridSpec(
            num_scalar_prefetch=0,
            grid=grid,
            in_specs=[
                # Whole padded image of batch element b; index depends only on
                # b, so Pallas skips the re-fetch across the inner tile axis.
                pl.BlockSpec((None, hp, wp, c_in), lambda b, t: (b, 0, 0, 0)),
                pl.BlockSpec((kh, kw, c_in, np_out), lambda b, t: (0, 0, 0, 0)),
                pl.BlockSpec((1, np_out), lambda b, t: (0, 0)),
            ],
            out_specs=pl.BlockSpec((None, tm, np_out), lambda b, t: (b, t, 0)),
        ),
        compiler_params=pltpu.CompilerParams(
            dimension_semantics=("parallel", "parallel"),
            vmem_limit_bytes=vmem_limit,
        ),
        cost_estimate=cost,
    )(xp, w_hwio, b_row)

    out = out3d[:, :, :c_out].reshape(n, ho, wo, c_out)
    return jnp.transpose(out, (0, 3, 1, 2))                 # back to NCHW


# ---------------------------------------------------------------------------
# Pure-JAX f32 reference mirroring the PyTorch math (for self-check).
# ---------------------------------------------------------------------------
def _reference(x, weight, bias, *, bits, stride, padding):
    if isinstance(bits, int):
        bits = [bits]
    c_out = weight.shape[0]
    wq = _mix_quant_weight(weight, bits, c_out)
    bq = _bias_asym_min_max_quantize(bias, 32)
    out = jax.lax.conv_general_dilated(
        x, wq, window_strides=(stride, stride),
        padding=[(padding, padding), (padding, padding)],
        dimension_numbers=("NCHW", "OIHW", "NCHW"))
    return out + bq.reshape(1, -1, 1, 1)


if __name__ == "__main__":
    key = jax.random.PRNGKey(0)
    k1, k2, k3 = jax.random.split(key, 3)

    # Small shapes; batch=4, Ho=16 -> grid (4, 2) exercises the oh-tiled path.
    N, C_in, H, W = 4, 4, 16, 16
    C_out, ksize, stride, padding = 8, 3, 1, 1
    bits = [2, 4]        # multi-precision list; alpha argmax selects bits[0]

    x = jax.random.normal(k1, (N, C_in, H, W), dtype=jnp.float32)
    fan_in = C_in * ksize * ksize
    bound = 1.0 / math.sqrt(fan_in)
    weight = jax.random.uniform(k2, (C_out, C_in, ksize, ksize),
                                dtype=jnp.float32, minval=-bound, maxval=bound)
    bias = jax.random.uniform(k3, (C_out,), dtype=jnp.float32,
                              minval=-bound, maxval=bound)

    out = quant_multi_prec_conv2d(x, weight, bias, bits=bits,
                                  stride=stride, padding=padding)
    out = jax.block_until_ready(out)

    ref = _reference(x, weight, bias, bits=bits, stride=stride, padding=padding)
    assert out.shape == (N, C_out, H, W), out.shape
    # bf16 MXU operands -> small drift vs the pure-f32 reference is expected.
    max_err = float(jnp.max(jnp.abs(out - ref)))
    assert jnp.allclose(out, ref, atol=5e-2, rtol=5e-2), max_err

    print("KERNEL_OK")
</pallas_src>

<mosaic_0001>
module attributes {stable_mosaic.version = 11 : i64} {
  func.func @kernel(%arg0: i32, %arg1: i32, %arg2: memref<1x18x18x4xbf16, #tpu.memory_space<vmem>>, %arg3: memref<3x3x4x8xbf16, #tpu.memory_space<vmem>>, %arg4: memref<1x8xf32, #tpu.memory_space<vmem>>, %arg5: memref<1x128x8xf32, #tpu.memory_space<vmem>>) attributes {dimension_semantics = [#tpu.dimension_semantics<parallel>, #tpu.dimension_semantics<parallel>], iteration_bounds = array<i64: 4, 2>, scalar_prefetch = 0 : i64, scratch_operands = 0 : i64, tpu.core_type = #tpu.core_type<tc>, window_params = [{transform_indices = @transform_0, window_bounds = array<i64: 1, 18, 18, 4>}, {pipeline_mode = #tpu.pipeline_mode<synchronous>, transform_indices = @transform_1, window_bounds = array<i64: 3, 3, 4, 8>}, {pipeline_mode = #tpu.pipeline_mode<synchronous>, transform_indices = @transform_2, window_bounds = array<i64: 1, 8>}, {transform_indices = @transform_3, window_bounds = array<i64: 1, 128, 8>}]} {
    %c8_i32 = arith.constant 8 : i32
    %0 = arith.muli %arg1, %c8_i32 : i32
    %cst = arith.constant 0.000000e+00 : f32
    %1 = vector.broadcast %cst : f32 to vector<128x8xf32>
    %c0_i32 = arith.constant 0 : i32
    %2 = arith.addi %0, %c0_i32 : i32
    %c0 = arith.constant 0 : index
    %3 = arith.index_cast %2 : i32 to index
    %c0_0 = arith.constant 0 : index
    %c0_1 = arith.constant 0 : index
    %4 = vector.load %arg2[%c0, %3, %c0_0, %c0_1] : memref<1x18x18x4xbf16, #tpu.memory_space<vmem>>, vector<1x8x16x4xbf16>
    %5 = vector.shape_cast %4 : vector<1x8x16x4xbf16> to vector<8x16x4xbf16>
    %6 = vector.shape_cast %5 : vector<8x16x4xbf16> to vector<128x4xbf16>
    %c0_2 = arith.constant 0 : index
    %c0_3 = arith.constant 0 : index
    %c0_4 = arith.constant 0 : index
    %c0_5 = arith.constant 0 : index
    %7 = vector.load %arg3[%c0_2, %c0_3, %c0_4, %c0_5] : memref<3x3x4x8xbf16, #tpu.memory_space<vmem>>, vector<1x1x4x8xbf16>
    %8 = vector.shape_cast %7 : vector<1x1x4x8xbf16> to vector<4x8xbf16>
    %cst_6 = arith.constant dense<0.000000e+00> : vector<128x8xf32>
    %9 = tpu.matmul %6, %8, %cst_6 {dimension_numbers = #tpu.dot_dimension_numbers<[1], [0], [0], [1], [0, 0, 1, 1], [], []>} : vector<128x4xbf16>, vector<4x8xbf16>, vector<128x8xf32> -> vector<128x8xf32>
    %10 = arith.addf %1, %9 : vector<128x8xf32>
    %c0_i32_7 = arith.constant 0 : i32
    %11 = arith.addi %0, %c0_i32_7 : i32
    %c0_8 = arith.constant 0 : index
    %12 = arith.index_cast %11 : i32 to index
    %c1 = arith.constant 1 : index
    %c0_9 = arith.constant 0 : index
    %13 = vector.load %arg2[%c0_8, %12, %c1, %c0_9] : memref<1x18x18x4xbf16, #tpu.memory_space<vmem>>, vector<1x8x16x4xbf16>
    %14 = vector.shape_cast %13 : vector<1x8x16x4xbf16> to vector<8x16x4xbf16>
    %15 = vector.shape_cast %14 : vector<8x16x4xbf16> to vector<128x4xbf16>
    %c0_10 = arith.constant 0 : index
    %c1_11 = arith.constant 1 : index
    %c0_12 = arith.constant 0 : index
    %c0_13 = arith.constant 0 : index
    %16 = vector.load %arg3[%c0_10, %c1_11, %c0_12, %c0_13] : memref<3x3x4x8xbf16, #tpu.memory_space<vmem>>, vector<1x1x4x8xbf16>
    %17 = vector.shape_cast %16 : vector<1x1x4x8xbf16> to vector<4x8xbf16>
    %cst_14 = arith.constant dense<0.000000e+00> : vector<128x8xf32>
    %18 = tpu.matmul %15, %17, %cst_14 {dimension_numbers = #tpu.dot_dimension_numbers<[1], [0], [0], [1], [0, 0, 1, 1], [], []>} : vector<128x4xbf16>, vector<4x8xbf16>, vector<128x8xf32> -> vector<128x8xf32>
    %19 = arith.addf %10, %18 : vector<128x8xf32>
    %c0_i32_15 = arith.constant 0 : i32
    %20 = arith.addi %0, %c0_i32_15 : i32
    %c0_16 = arith.constant 0 : index
    %21 = arith.index_cast %20 : i32 to index
    %c2 = arith.constant 2 : index
    %c0_17 = arith.constant 0 : index
    %22 = vector.load %arg2[%c0_16, %21, %c2, %c0_17] : memref<1x18x18x4xbf16, #tpu.memory_space<vmem>>, vector<1x8x16x4xbf16>
    %23 = vector.shape_cast %22 : vector<1x8x16x4xbf16> to vector<8x16x4xbf16>
    %24 = vector.shape_cast %23 : vector<8x16x4xbf16> to vector<128x4xbf16>
    %c0_18 = arith.constant 0 : index
    %c2_19 = arith.constant 2 : index
    %c0_20 = arith.constant 0 : index
    %c0_21 = arith.constant 0 : index
    %25 = vector.load %arg3[%c0_18, %c2_19, %c0_20, %c0_21] : memref<3x3x4x8xbf16, #tpu.memory_space<vmem>>, vector<1x1x4x8xbf16>
    %26 = vector.shape_cast %25 : vector<1x1x4x8xbf16> to vector<4x8xbf16>
    %cst_22 = arith.constant dense<0.000000e+00> : vector<128x8xf32>
    %27 = tpu.matmul %24, %26, %cst_22 {dimension_numbers = #tpu.dot_dimension_numbers<[1], [0], [0], [1], [0, 0, 1, 1], [], []>} : vector<128x4xbf16>, vector<4x8xbf16>, vector<128x8xf32> -> vector<128x8xf32>
    %28 = arith.addf %19, %27 : vector<128x8xf32>
    %c1_i32 = arith.constant 1 : i32
    %29 = arith.addi %0, %c1_i32 : i32
    %c0_23 = arith.constant 0 : index
    %30 = arith.index_cast %29 : i32 to index
    %c0_24 = arith.constant 0 : index
    %c0_25 = arith.constant 0 : index
    %31 = vector.load %arg2[%c0_23, %30, %c0_24, %c0_25] : memref<1x18x18x4xbf16, #tpu.memory_space<vmem>>, vector<1x8x16x4xbf16>
    %32 = vector.shape_cast %31 : vector<1x8x16x4xbf16> to vector<8x16x4xbf16>
    %33 = vector.shape_cast %32 : vector<8x16x4xbf16> to vector<128x4xbf16>
    %c1_26 = arith.constant 1 : index
    %c0_27 = arith.constant 0 : index
    %c0_28 = arith.constant 0 : index
    %c0_29 = arith.constant 0 : index
    %34 = vector.load %arg3[%c1_26, %c0_27, %c0_28, %c0_29] : memref<3x3x4x8xbf16, #tpu.memory_space<vmem>>, vector<1x1x4x8xbf16>
    %35 = vector.shape_cast %34 : vector<1x1x4x8xbf16> to vector<4x8xbf16>
    %cst_30 = arith.constant dense<0.000000e+00> : vector<128x8xf32>
    %36 = tpu.matmul %33, %35, %cst_30 {dimension_numbers = #tpu.dot_dimension_numbers<[1], [0], [0], [1], [0, 0, 1, 1], [], []>} : vector<128x4xbf16>, vector<4x8xbf16>, vector<128x8xf32> -> vector<128x8xf32>
    %37 = arith.addf %28, %36 : vector<128x8xf32>
    %c1_i32_31 = arith.constant 1 : i32
    %38 = arith.addi %0, %c1_i32_31 : i32
    %c0_32 = arith.constant 0 : index
    %39 = arith.index_cast %38 : i32 to index
    %c1_33 = arith.constant 1 : index
    %c0_34 = arith.constant 0 : index
    %40 = vector.load %arg2[%c0_32, %39, %c1_33, %c0_34] : memref<1x18x18x4xbf16, #tpu.memory_space<vmem>>, vector<1x8x16x4xbf16>
    %41 = vector.shape_cast %40 : vector<1x8x16x4xbf16> to vector<8x16x4xbf16>
    %42 = vector.shape_cast %41 : vector<8x16x4xbf16> to vector<128x4xbf16>
    %c1_35 = arith.constant 1 : index
    %c1_36 = arith.constant 1 : index
    %c0_37 = arith.constant 0 : index
    %c0_38 = arith.constant 0 : index
    %43 = vector.load %arg3[%c1_35, %c1_36, %c0_37, %c0_38] : memref<3x3x4x8xbf16, #tpu.memory_space<vmem>>, vector<1x1x4x8xbf16>
    %44 = vector.shape_cast %43 : vector<1x1x4x8xbf16> to vector<4x8xbf16>
    %cst_39 = arith.constant dense<0.000000e+00> : vector<128x8xf32>
    %45 = tpu.matmul %42, %44, %cst_39 {dimension_numbers = #tpu.dot_dimension_numbers<[1], [0], [0], [1], [0, 0, 1, 1], [], []>} : vector<128x4xbf16>, vector<4x8xbf16>, vector<128x8xf32> -> vector<128x8xf32>
    %46 = arith.addf %37, %45 : vector<128x8xf32>
    %c1_i32_40 = arith.constant 1 : i32
    %47 = arith.addi %0, %c1_i32_40 : i32
    %c0_41 = arith.constant 0 : index
    %48 = arith.index_cast %47 : i32 to index
    %c2_42 = arith.constant 2 : index
    %c0_43 = arith.constant 0 : index
    %49 = vector.load %arg2[%c0_41, %48, %c2_42, %c0_43] : memref<1x18x18x4xbf16, #tpu.memory_space<vmem>>, vector<1x8x16x4xbf16>
    %50 = vector.shape_cast %49 : vector<1x8x16x4xbf16> to vector<8x16x4xbf16>
    %51 = vector.shape_cast %50 : vector<8x16x4xbf16> to vector<128x4xbf16>
    %c1_44 = arith.constant 1 : index
    %c2_45 = arith.constant 2 : index
    %c0_46 = arith.constant 0 : index
    %c0_47 = arith.constant 0 : index
    %52 = vector.load %arg3[%c1_44, %c2_45, %c0_46, %c0_47] : memref<3x3x4x8xbf16, #tpu.memory_space<vmem>>, vector<1x1x4x8xbf16>
    %53 = vector.shape_cast %52 : vector<1x1x4x8xbf16> to vector<4x8xbf16>
    %cst_48 = arith.constant dense<0.000000e+00> : vector<128x8xf32>
    %54 = tpu.matmul %51, %53, %cst_48 {dimension_numbers = #tpu.dot_dimension_numbers<[1], [0], [0], [1], [0, 0, 1, 1], [], []>} : vector<128x4xbf16>, vector<4x8xbf16>, vector<128x8xf32> -> vector<128x8xf32>
    %55 = arith.addf %46, %54 : vector<128x8xf32>
    %c2_i32 = arith.constant 2 : i32
    %56 = arith.addi %0, %c2_i32 : i32
    %c0_49 = arith.constant 0 : index
    %57 = arith.index_cast %56 : i32 to index
    %c0_50 = arith.constant 0 : index
    %c0_51 = arith.constant 0 : index
    %58 = vector.load %arg2[%c0_49, %57, %c0_50, %c0_51] : memref<1x18x18x4xbf16, #tpu.memory_space<vmem>>, vector<1x8x16x4xbf16>
    %59 = vector.shape_cast %58 : vector<1x8x16x4xbf16> to vector<8x16x4xbf16>
    %60 = vector.shape_cast %59 : vector<8x16x4xbf16> to vector<128x4xbf16>
    %c2_52 = arith.constant 2 : index
    %c0_53 = arith.constant 0 : index
    %c0_54 = arith.constant 0 : index
    %c0_55 = arith.constant 0 : index
    %61 = vector.load %arg3[%c2_52, %c0_53, %c0_54, %c0_55] : memref<3x3x4x8xbf16, #tpu.memory_space<vmem>>, vector<1x1x4x8xbf16>
    %62 = vector.shape_cast %61 : vector<1x1x4x8xbf16> to vector<4x8xbf16>
    %cst_56 = arith.constant dense<0.000000e+00> : vector<128x8xf32>
    %63 = tpu.matmul %60, %62, %cst_56 {dimension_numbers = #tpu.dot_dimension_numbers<[1], [0], [0], [1], [0, 0, 1, 1], [], []>} : vector<128x4xbf16>, vector<4x8xbf16>, vector<128x8xf32> -> vector<128x8xf32>
    %64 = arith.addf %55, %63 : vector<128x8xf32>
    %c2_i32_57 = arith.constant 2 : i32
    %65 = arith.addi %0, %c2_i32_57 : i32
    %c0_58 = arith.constant 0 : index
    %66 = arith.index_cast %65 : i32 to index
    %c1_59 = arith.constant 1 : index
    %c0_60 = arith.constant 0 : index
    %67 = vector.load %arg2[%c0_58, %66, %c1_59, %c0_60] : memref<1x18x18x4xbf16, #tpu.memory_space<vmem>>, vector<1x8x16x4xbf16>
    %68 = vector.shape_cast %67 : vector<1x8x16x4xbf16> to vector<8x16x4xbf16>
    %69 = vector.shape_cast %68 : vector<8x16x4xbf16> to vector<128x4xbf16>
    %c2_61 = arith.constant 2 : index
    %c1_62 = arith.constant 1 : index
    %c0_63 = arith.constant 0 : index
    %c0_64 = arith.constant 0 : index
    %70 = vector.load %arg3[%c2_61, %c1_62, %c0_63, %c0_64] : memref<3x3x4x8xbf16, #tpu.memory_space<vmem>>, vector<1x1x4x8xbf16>
    %71 = vector.shape_cast %70 : vector<1x1x4x8xbf16> to vector<4x8xbf16>
    %cst_65 = arith.constant dense<0.000000e+00> : vector<128x8xf32>
    %72 = tpu.matmul %69, %71, %cst_65 {dimension_numbers = #tpu.dot_dimension_numbers<[1], [0], [0], [1], [0, 0, 1, 1], [], []>} : vector<128x4xbf16>, vector<4x8xbf16>, vector<128x8xf32> -> vector<128x8xf32>
    %73 = arith.addf %64, %72 : vector<128x8xf32>
    %c2_i32_66 = arith.constant 2 : i32
    %74 = arith.addi %0, %c2_i32_66 : i32
    %c0_67 = arith.constant 0 : index
    %75 = arith.index_cast %74 : i32 to index
    %c2_68 = arith.constant 2 : index
    %c0_69 = arith.constant 0 : index
    %76 = vector.load %arg2[%c0_67, %75, %c2_68, %c0_69] : memref<1x18x18x4xbf16, #tpu.memory_space<vmem>>, vector<1x8x16x4xbf16>
    %77 = vector.shape_cast %76 : vector<1x8x16x4xbf16> to vector<8x16x4xbf16>
    %78 = vector.shape_cast %77 : vector<8x16x4xbf16> to vector<128x4xbf16>
    %c2_70 = arith.constant 2 : index
    %c2_71 = arith.constant 2 : index
    %c0_72 = arith.constant 0 : index
    %c0_73 = arith.constant 0 : index
    %79 = vector.load %arg3[%c2_70, %c2_71, %c0_72, %c0_73] : memref<3x3x4x8xbf16, #tpu.memory_space<vmem>>, vector<1x1x4x8xbf16>
    %80 = vector.shape_cast %79 : vector<1x1x4x8xbf16> to vector<4x8xbf16>
    %cst_74 = arith.constant dense<0.000000e+00> : vector<128x8xf32>
    %81 = tpu.matmul %78, %80, %cst_74 {dimension_numbers = #tpu.dot_dimension_numbers<[1], [0], [0], [1], [0, 0, 1, 1], [], []>} : vector<128x4xbf16>, vector<4x8xbf16>, vector<128x8xf32> -> vector<128x8xf32>
    %82 = arith.addf %73, %81 : vector<128x8xf32>
    %c0_75 = arith.constant 0 : index
    %c0_76 = arith.constant 0 : index
    %83 = vector.load %arg4[%c0_75, %c0_76] : memref<1x8xf32, #tpu.memory_space<vmem>>, vector<1x8xf32>
    %84 = vector.broadcast %83 : vector<1x8xf32> to vector<128x8xf32>
    %85 = arith.addf %82, %84 : vector<128x8xf32>
    %c0_77 = arith.constant 0 : index
    %c0_78 = arith.constant 0 : index
    %c0_79 = arith.constant 0 : index
    %86 = vector.load %arg5[%c0_77, %c0_78, %c0_79] : memref<1x128x8xf32, #tpu.memory_space<vmem>>, vector<1x128x8xf32>
    %87 = vector.shape_cast %86 : vector<1x128x8xf32> to vector<128x8xf32>
    %88 = vector.shape_cast %85 : vector<128x8xf32> to vector<1x128x8xf32>
    tpu.vector_store %arg5[%c0_77, %c0_78, %c0_79], %88 {strides = array<i32>} : memref<1x128x8xf32, #tpu.memory_space<vmem>>, vector<1x128x8xf32>,
    return
  }
  func.func @transform_0(%arg0: i32, %arg1: i32) -> (i32, i32, i32, i32) {
    %c0_i32 = arith.constant 0 : i32
    %c0_i32_0 = arith.constant 0 : i32
    %c0_i32_1 = arith.constant 0 : i32
    %c0_i32_2 = arith.constant 0 : i32
    return %arg0, %c0_i32, %c0_i32_0, %c0_i32_1 : i32, i32, i32, i32
  }
  func.func @transform_1(%arg0: i32, %arg1: i32) -> (i32, i32, i32, i32) {
    %c0_i32 = arith.constant 0 : i32
    %c0_i32_0 = arith.constant 0 : i32
    %c0_i32_1 = arith.constant 0 : i32
    %c0_i32_2 = arith.constant 0 : i32
    %c0_i32_3 = arith.constant 0 : i32
    return %c0_i32, %c0_i32_0, %c0_i32_1, %c0_i32_2 : i32, i32, i32, i32
  }
  func.func @transform_2(%arg0: i32, %arg1: i32) -> (i32, i32) {
    %c0_i32 = arith.constant 0 : i32
    %c0_i32_0 = arith.constant 0 : i32
    %c0_i32_1 = arith.constant 0 : i32
    return %c0_i32, %c0_i32_0 : i32, i32
  }
  func.func @transform_3(%arg0: i32, %arg1: i32) -> (i32, i32, i32) {
    %c0_i32 = arith.constant 0 : i32
    %c0_i32_0 = arith.constant 0 : i32
    return %arg0, %arg1, %c0_i32 : i32, i32, i32
  }
}

</mosaic_0001>

<bundles_post_ra>
// kernel: tpu_custom_call.1
= control target key start
LH: loop header
LB: loop body
LE: loop exit
PB: predicated region body
PF: predicated region fallthrough
CT: control target
= control target key end

     0   :  { %s3595_s12 = smov 0   ;;  %s3597_s13 = smov 0   ;;  %s4566_s0 = inlined_call_operand.vmem [shape: bf16[4,18,18,4], index: 0, kind: input, shape index: {}]   ;;  %s4567_s1 = inlined_call_operand.vmem [shape: bf16[3,3,4,8], index: 1, kind: input, shape index: {}]   ;;  %s4568_s2 = inlined_call_operand.vmem [shape: f32[1,8], index: 2, kind: input, shape index: {}]   ;;  %s4569_s3 = inlined_call_operand.vmem [shape: f32[4,256,8], index: 3, kind: output, shape index: {}]  }
   0x1   :  { %s3599_s14 = smov 0   ;;  %s3601_s15 = smov 0  }
   0x2   :  { %s3603_s16 = smov 0  }
   0x3 LB: > { %s22_s17 = sadd.s32 1, %s3565_s14  ;;  %s25_s18 = sadd.s32 1, %s3569_s15  ;;  %s3573_s16 = sphi %s3603_s16, %s13_s16   ;;  %s3569_s15 = sphi %s3601_s15, %s4595_s15   ;;  %s3565_s14 = sphi %s3599_s14, %s4594_s14   ;;  %s3561_s13 = sphi %s3597_s13, %s4593_s13   ;;  %s3557_s12 = sphi %s3595_s12, %s4592_s12  }
   0x4   : > { %p23_p0 = scmp.ge.s32.totalorder %s22_s17, 2  ;;  %p2798_p1 = scmp.ge.s32.totalorder %s3573_s16, 1 }
   0x5   : > { %p151_p2 = scmp.lt.s32.totalorder %s3573_s16, 9 }
   0x6   : > { %s4597_s17 = smov (%p23_p0, %s22_s17), 0  ;;  %s4599_s18 = smov (!%p23_p0, %s25_s18), %s3569_s15 }
   0x7   : > { %p152_p3 = pnand %p2798_p1, %p151_p2  ;;  %p27_p4 = scmp.ge.s32.totalorder %s4599_s18, 4 }
   0x9   : > { %s4601_s18 = smov (%p27_p4, %s4599_s18), 0  ;;  %155 = sbr.rel (%p152_p3) target bundleno = 419 (0x1a3), region = 32 }
  0x10   : > { %v2806_v0 = vld [vmem:[%s4567_s1 + $0x2] sm:$0x3]  ;;  %vm470_vm0 = vcmask 1041408   ;;  %v2923_v1 = vld [vmem:[%s4567_s1 + $0x8] sm:$0x3]  ;;  %p179_p5 = scmp.lt.s32.totalorder %s3561_s13, 3 }
  0x11   : > { %3459 = vmatprep.subr.msk.bf16.mxu1 %vm470_vm0, %v2806_v0  ;;  %3463 = vmatprep.subr.msk.bf16.mxu0 %vm470_vm0, %v2923_v1  ;;  %v472_v2 = vsel %vm470_vm0, %v2806_v0, 0  ;;  %v3637_v3 = vsel %vm470_vm0, %v2923_v1, 0  ;;  %v215_v4 = vld [vmem:[%s4567_s1] sm:$0x3]  ;;  %s3085_s25 = smul.u32 96, %s3557_s12  ;;  %vm445_vm3 = vcmask 31744  }
  0x12   : > { %3168 = vmatpush3.bf16.msra.mxu1 %v472_v2  ;;  %3240 = vmatpush3.bf16.msra.mxu0 %v3637_v3  ;;  %s4603_s13 = smov (!%p179_p5, %s3561_s13), 3  ;;  %v2956_v5 = vld [vmem:[%s4567_s1 + $0xa] sm:$0x3]  ;;  %vm224_vm1 = vsmask.f32 3328  ;;  %v3679_v17 = vsel %vm470_vm0, %v215_v4, 0 }
  0x13   : > { %3460 = vmatprep.subr.msk.bf16.mxu1 %vm470_vm0, %v215_v4  ;;  %s3469_s28 = smul.u32 216, %s4603_s13  ;;  %3465 = vmatprep.subr.msk.bf16.mxu0 %vm470_vm0, %v2956_v5  ;;  %vm225_vm2 = vsmask.f32 7440  ;;  %v3685_v26 = vld [vmem:[%s4567_s1 + $0xc] sm:$0x3]  ;;  %v3702_v37 = vsel %vm470_vm0, %v2956_v5, 0 }
  0x14   : > { %vm3694_vm4 = vmor %vm224_vm1, %vm225_vm2  ;;  %v3706_v41 = vsel %vm470_vm0, %v3685_v26, 0  ;;  %vm759_vm5 = vcmask 1042432   ;;  %vm760_vm6 = vcmask 1046532   ;;  %s2801_s26 = sshll.u32 %s4603_s13, 5  ;;  %vm2683_vm8 = vcmask 64512  }
  0x15   : > { %s183_s4 = scalar_lea.vmem %s4566_s0, %s3469_s28  ;;  %vm3849_vm7 = vmor %vm759_vm5, %vm760_vm6 }
  0x16   : > { %s3655_s5 = scalar_lea.vmem %s183_s4, %s3085_s25  ;;  %s2800_s25 = sshll.u32 %s3557_s12, 4 }
  0x17   : > { %v3658_v6 = vld [vmem:[%s3655_s5] sm:$0xf]  ;;  %v3661_v7 = vld [vmem:[%s3655_s5 + $0x4] sm:$0xf]  ;;  %v3664_v8 = vld [vmem:[%s3655_s5 + $0x8] sm:$0x1] }
  0x18   : > { %v228_v9 = vshrl.u32 %v3658_v6, 16  ;;  %v231_v10 = vshll.u32 %v3658_v6, 16  ;;  %v237_v11 = vshll.u32 %v3661_v7, 16  ;;  %v241_v12 = vshrl.u32 %v3661_v7, 16  ;;  %v2899_v13 = vld [vmem:[%s3655_s5 + $0xc] sm:$0xf] }
  0x19   : > { %v247_v14 = vshll.u32 %v3664_v8, 16  ;;  %v3673_v15 = vld [vmem:[%s3655_s5 + $0x10] sm:$0xf]  ;;  %v3676_v16 = vld [vmem:[%s3655_s5 + $0x14] sm:$0x1]  ;;  %v1211_v23 = vshrl.u32 %v2899_v13, 16 }
  0x1a   : > { %v230_v18 = vrot.slane %v228_v9, 4  ;;  %v233_v19 = vrot.slane %v231_v10, 5  ;;  %v239_v20 = vrot.slane %v237_v11, 5  ;;  %v243_v21 = vrot.slane %v241_v12, 4  ;;  %v3690_v31 = vld [vmem:[%s3655_s5 + $0xc] sm:$0xf] }
  0x1b   : > { %v249_v22 = vrot.slane %v247_v14, 5  ;;  %v1214_v24 = vshll.u32 %v2899_v13, 16  ;;  %v1220_v25 = vshll.u32 %v3673_v15, 16  ;;  %v1224_v29 = vshrl.u32 %v3673_v15, 16  ;;  %v3699_v36 = vld [vmem:[%s3655_s5 + $0x10] sm:$0xf] }
  0x1c   : > { %v234_v27 = vor.u32 %v233_v19, %v230_v18  ;;  %v244_v28 = vor.u32 %v243_v21, %v239_v20  ;;  %v1230_v30 = vshll.u32 %v3676_v16, 16  ;;  %v1213_v33 = vrot.slane %v1211_v23, 4  ;;  %v3709_v44 = vld [vmem:[%s3655_s5 + $0x14] sm:$0x1]  ;;  %v2902_v55 = vld [vmem:[%s3655_s5 + $0x18] sm:$0xf] }
  0x1d   : > { %v1216_v34 = vrot.slane %v1214_v24, 5  ;;  %v1222_v35 = vrot.slane %v1220_v25, 5  ;;  %v1226_v40 = vrot.slane %v1224_v29, 4  ;;  %v252_v45 = vshrl.u32 %v3690_v31, 16  ;;  %v3722_v60 = vld [vmem:[%s3655_s5 + $0x1c] sm:$0xf] }
  0x1e   : > { %v235_v38 = vrot.slane %v234_v27, 4  ;;  %v245_v39 = vrot.slane %v244_v28, 4  ;;  %v1232_v43 = vrot.slane %v1230_v30, 5  ;;  %v255_v46 = vshll.u32 %v3690_v31, 16  ;;  %v3730_v1 = vld [vmem:[%s3655_s5 + $0x20] sm:$0x1] }
  0x1f   : > { %v1217_v42 = vor.u32 %v1216_v34, %v1213_v33  ;;  %v1227_v49 = vor.u32 %v1226_v40, %v1222_v35  ;;  %v261_v50 = vshll.u32 %v3699_v36, 16  ;;  %v254_v53 = vrot.slane %v252_v45, 4  ;;  %v3738_v21 = vld [vmem:[%s3655_s5 + $0x18] sm:$0xf]  ;;  %v3745_v27 = vld [vmem:[%s3655_s5 + $0x1c] sm:$0xf] }
  0x20   : > { %v240_v47 = vsel %vm3694_vm4, %v235_v38, %v239_v20  ;;  %v250_v48 = vsel %vm3694_vm4, %v245_v39, %v249_v22  ;;  %v257_v54 = vrot.slane %v255_v46, 5  ;;  %v265_v58 = vshrl.u32 %v3699_v36, 16  ;;  %v3753_v38 = vld [vmem:[%s3655_s5 + $0x20] sm:$0x1]  ;;  %p187_p6 = scmp.lt.s32.totalorder %s2800_s25, 31 }
  0x21   : > { %v2807_v51 = vcombine.low %v240_v47, %v250_v48  ;;  %v1218_v52 = vrot.slane %v1217_v42, 4  ;;  %v1228_v56 = vrot.slane %v1227_v49, 4  ;;  %v263_v57 = vrot.slane %v261_v50, 5  ;;  %v2905_v47 = vld [vmem:[%s3655_s5 + $0x24] sm:$0xf] }
  0x22   : > { %v271_v59 = vshll.u32 %v3709_v44, 16  ;;  %v1602_v62 = vrot.slane %v3673_v15, 5  ;;  %v1605_v63 = vrot.slane %v3676_v16, 5  ;;  %v258_v0 = vor.u32 %v257_v54, %v254_v53  ;;  %s4605_s25 = smov (!%p187_p6, %s2800_s25), 31 }
  0x23   : > { %3169 = vmatprep.mubr.msk.bf16.mxu1 %vm445_vm3, %v2807_v51  ;;  %v1223_v61 = vsel %vm3694_vm4, %v1218_v52, %v1222_v35  ;;  %v1233_v2 = vsel %vm3694_vm4, %v1228_v56, %v1232_v43  ;;  %v267_v4 = vrot.slane %v265_v58, 4  ;;  %v1235_v9 = vshrl.u32 %v2902_v55, 16  ;;  %v3763_v52 = vld [vmem:[%s3655_s5 + $0x28] sm:$0xf]  ;;  %s190_s27 = sadd.s32 %s2801_s26, %s4605_s25 }
  0x24   : > { %v273_v5 = vrot.slane %v271_v59, 5  ;;  %v2924_v10 = vcombine.low %v1223_v61, %v1233_v2  ;;  %v259_v11 = vrot.slane %v258_v0, 4  ;;  %v1238_v12 = vshll.u32 %v2902_v55, 16  ;;  %v3775_v61 = vld [vmem:[%s3655_s5 + $0x2c] sm:$0x1]  ;;  %s2802_s28 = sshll.u32 %s190_s27, 3 }
  0x25   : > { %v1244_v13 = vshll.u32 %v3722_v60, 16  ;;  %v268_v14 = vor.u32 %v267_v4, %v263_v57  ;;  %v1237_v18 = vrot.slane %v1235_v9, 4  ;;  %v1248_v19 = vshrl.u32 %v3722_v60, 16 }
  0x26   : > { %v1254_v20 = vshll.u32 %v3730_v1, 16  ;;  %3241 = vmatprep.mubr.msk.bf16.mxu0 %vm445_vm3, %v2924_v10  ;;  %v264_v22 = vsel %vm3694_vm4, %v259_v11, %v263_v57  ;;  %v1240_v23 = vrot.slane %v1238_v12, 5  ;;  %v1609_v25 = vrot.slane %v3722_v60, 5  ;;  %v3769_v57 = vld [vmem:[%s4567_s1 + $0x4] sm:$0x3] }
  0x27   : > { %v1246_v24 = vrot.slane %v1244_v13, 5  ;;  %v269_v28 = vrot.slane %v268_v14, 4  ;;  %v1250_v29 = vrot.slane %v1248_v19, 4  ;;  %v1612_v33 = vrot.slane %v3730_v1, 5  ;;  %v3782_v11 = vld [vmem:[%s3655_s5 + $0x24] sm:$0xf] }
  0x28   : > { %v1256_v30 = vrot.slane %v1254_v20, 5  ;;  %v1241_v34 = vor.u32 %v1240_v23, %v1237_v18  ;;  %v3750_v35 = vrot.slane %v1609_v25, 4  ;;  %v276_v39 = vshrl.u32 %v3738_v21, 16  ;;  %v3785_v19 = vld [vmem:[%s3655_s5 + $0x28] sm:$0xf] }
  0x29   : > { %v279_v40 = vshll.u32 %v3738_v21, 16  ;;  %v274_v42 = vsel %vm3694_vm4, %v269_v28, %v273_v5  ;;  %v1251_v43 = vor.u32 %v1250_v29, %v1246_v24  ;;  %v285_v45 = vshll.u32 %v3745_v27, 16  ;;  %v3795_v29 = vld [vmem:[%s3655_s5 + $0x2c] sm:$0x1] }
  0x2a   : > { %v289_v46 = vshrl.u32 %v3745_v27, 16  ;;  %v2808_v48 = vcombine.low %v264_v22, %v274_v42  ;;  %v1242_v49 = vrot.slane %v1241_v34, 4  ;;  %v278_v50 = vrot.slane %v276_v39, 4 }
  0x2b   : > { %v281_v51 = vrot.slane %v279_v40, 5  ;;  %v1252_v53 = vrot.slane %v1251_v43, 4  ;;  %v287_v54 = vrot.slane %v285_v45, 5  ;;  %v295_v56 = vshll.u32 %v3753_v38, 16  ;;  %v2908_v45 = vld [vmem:[%s3655_s5 + $0x30] sm:$0xf] }
  0x2c   : > { %v291_v55 = vrot.slane %v289_v46, 4  ;;  %3170 = vmatmul.mubr.msk.bf16.vlgmr.msra.gmra.mrb[0].mxu1 %vm445_vm3, %v2808_v48  ;;  %v1247_v58 = vsel %vm3694_vm4, %v1242_v49, %v1246_v24  ;;  %v1259_v0 = vshrl.u32 %v2905_v47, 16  ;;  %v1262_v2 = vshll.u32 %v2905_v47, 16 }
  0x2d   : > { %v282_v59 = vor.u32 %v281_v51, %v278_v50  ;;  %3186 = vmatpush3.bf16.msra.mxu1 %v3679_v17  ;;  %v1257_v4 = vsel %vm3694_vm4, %v1252_v53, %v1256_v30  ;;  %v297_v9 = vrot.slane %v295_v56, 5  ;;  %v1268_v10 = vshll.u32 %v3763_v52, 16  ;;  %v3805_v50 = vld [vmem:[%s3655_s5 + $0x34] sm:$0xf] }
  0x2e   : > { %v292_v5 = vor.u32 %v291_v55, %v287_v54  ;;  %v2925_v12 = vcombine.low %v1247_v58, %v1257_v4  ;;  %v1261_v14 = vrot.slane %v1259_v0, 4  ;;  %v1264_v18 = vrot.slane %v1262_v2, 5  ;;  %3461 = vmatprep.subr.msk.bf16.mxu1 %vm470_vm0, %v3769_v57  ;;  %v3815_v58 = vld [vmem:[%s3655_s5 + $0x38] sm:$0x1] }
  0x2f   : > { %v283_v13 = vrot.slane %v282_v59, 4  ;;  %v1270_v20 = vrot.slane %v1268_v10, 5  ;;  %v1272_v22 = vshrl.u32 %v3763_v52, 16  ;;  %v1278_v23 = vshll.u32 %v3775_v61, 16 }
  0x30   : > { %v293_v17 = vrot.slane %v292_v5, 4  ;;  %3242 = vmatmul.mubr.msk.bf16.vlgmr.msra.gmra.mrb[0].mxu0 %vm445_vm3, %v2925_v12  ;;  %v1265_v28 = vor.u32 %v1264_v18, %v1261_v14  ;;  %v300_v30 = vshrl.u32 %v3782_v11, 16  ;;  %v303_v34 = vshll.u32 %v3782_v11, 16  ;;  %v3820_v14 = vld [vmem:[%s3655_s5 + $0x30] sm:$0xf] }
  0x31   : > { %v288_v24 = vsel %vm3694_vm4, %v283_v13, %v287_v54  ;;  %3258 = vmatpush3.bf16.msra.mxu0 %v3702_v37  ;;  %v1274_v40 = vrot.slane %v1272_v22, 4  ;;  %v1280_v42 = vrot.slane %v1278_v23, 5  ;;  %v309_v43 = vshll.u32 %v3785_v19, 16  ;;  %v3826_v23 = vld [vmem:[%s3655_s5 + $0x34] sm:$0xf] }
  0x32   : > { %v298_v39 = vsel %vm3694_vm4, %v293_v17, %v297_v9  ;;  %v1266_v47 = vrot.slane %v1265_v28, 4  ;;  %v302_v48 = vrot.slane %v300_v30, 4  ;;  %v305_v49 = vrot.slane %v303_v34, 5  ;;  %3466 = vmatprep.subr.msk.bf16.mxu0 %vm470_vm0, %v3685_v26 }
  0x33   : > { %v2809_v46 = vcombine.low %v288_v24, %v298_v39  ;;  %v1275_v37 = vor.u32 %v1274_v40, %v1270_v20  ;;  %v311_v51 = vrot.slane %v309_v43, 5  ;;  %v313_v53 = vshrl.u32 %v3785_v19, 16  ;;  %v3831_v39 = vld [vmem:[%s3655_s5 + $0x38] sm:$0x1] }
  0x34   : > { %v319_v54 = vshll.u32 %v3795_v29, 16  ;;  %v1271_v55 = vsel %vm3694_vm4, %v1266_v47, %v1270_v20  ;;  %v306_v56 = vor.u32 %v305_v49, %v302_v48  ;;  %v1283_v59 = vshrl.u32 %v2908_v45, 16 }
  0x35   : > { %3173 = vmatprep.mubr.msk.bf16.mxu1 %vm445_vm3, %v2809_v46  ;;  %v1286_v0 = vshll.u32 %v2908_v45, 16  ;;  %v1276_v2 = vrot.slane %v1275_v37, 4  ;;  %v315_v26 = vrot.slane %v313_v53, 4  ;;  %v1292_v5 = vshll.u32 %v3805_v50, 16  ;;  %v2940_v37 = vld [vmem:[%s3655_s5 + $0xc] sm:$0xe] }
  0x36   : > { %v321_v4 = vrot.slane %v319_v54, 5  ;;  %v307_v9 = vrot.slane %v306_v56, 4  ;;  %v1285_v10 = vrot.slane %v1283_v59, 4  ;;  %v1296_v13 = vshrl.u32 %v3805_v50, 16  ;;  %v3843_v56 = vld [vmem:[%s3655_s5 + $0x3c] sm:$0xf] }
  0x37   : > { %v1288_v12 = vrot.slane %v1286_v0, 5  ;;  %v1281_v18 = vsel %vm3694_vm4, %v1276_v2, %v1280_v42  ;;  %v316_v17 = vor.u32 %v315_v26, %v311_v51  ;;  %v1294_v20 = vrot.slane %v1292_v5, 5 }
  0x38   : > { %v1302_v22 = vshll.u32 %v3815_v58, 16  ;;  %v2926_v24 = vcombine.low %v1271_v55, %v1281_v18  ;;  %v312_v28 = vsel %vm3694_vm4, %v307_v9, %v311_v51  ;;  %v1298_v34 = vrot.slane %v1296_v13, 4  ;;  %v3857_v18 = vld [vmem:[%s3655_s5 + $0x44] sm:$0x1] }
  0x39   : > { %v1289_v30 = vor.u32 %v1288_v12, %v1285_v10  ;;  %v317_v40 = vrot.slane %v316_v17, 4  ;;  %v324_v42 = vshrl.u32 %v3820_v14, 16  ;;  %v327_v45 = vshll.u32 %v3820_v14, 16  ;;  %v2941_v17 = vld [vmem:[%s3655_s5 + $0x18] sm:$0xe] }
  0x3a   : > { %v1304_v43 = vrot.slane %v1302_v22, 5  ;;  %3245 = vmatprep.mubr.msk.bf16.mxu0 %vm445_vm3, %v2926_v24  ;;  %v1299_v47 = vor.u32 %v1298_v34, %v1294_v20  ;;  %v333_v48 = vshll.u32 %v3826_v23, 16  ;;  %v337_v49 = vshrl.u32 %v3826_v23, 16 }
  0x3b   : > { %v1290_v46 = vrot.slane %v1289_v30, 4  ;;  %v322_v51 = vsel %vm3694_vm4, %v317_v40, %v321_v4  ;;  %v326_v53 = vrot.slane %v324_v42, 4  ;;  %v329_v54 = vrot.slane %v327_v45, 5  ;;  %v3854_v4 = vld [vmem:[%s3655_s5 + $0x40] sm:$0xf] }
  0x3c   : > { %v343_v55 = vshll.u32 %v3831_v39, 16  ;;  %v2810_v59 = vcombine.low %v312_v28, %v322_v51  ;;  %v1300_v2 = vrot.slane %v1299_v47, 4  ;;  %v335_v26 = vrot.slane %v333_v48, 5  ;;  %v3868_v30 = vld [vmem:[%s3655_s5 + $0x48] sm:$0xf] }
  0x3d   : > { %v1295_v0 = vsel %vm3694_vm4, %v1290_v46, %v1294_v20  ;;  %v330_v9 = vor.u32 %v329_v54, %v326_v53  ;;  %v339_v10 = vrot.slane %v337_v49, 4  ;;  %v2948_v13 = vrot.slane %v2940_v37, 9 }
  0x3e   : > { %v345_v12 = vrot.slane %v343_v55, 5  ;;  %3174 = vmatmul.mubr.msk.bf16.gmra.mrb[4].mxu1 %vm445_vm3, %v2810_v59  ;;  %v1305_v20 = vsel %vm3694_vm4, %v1300_v2, %v1304_v43  ;;  %v1604_v22 = vrot.slane %v1602_v62, 4  ;;  %v348_v24 = vshrl.u32 %v3843_v56, 16  ;;  %v3888_v55 = vld [vmem:[%s3655_s5 + $0x50] sm:$0x1] }
  0x3f   : > { %v351_v28 = vshll.u32 %v3843_v56, 16  ;;  %v2927_v34 = vcombine.low %v1295_v0, %v1305_v20  ;;  %v331_v40 = vrot.slane %v330_v9, 4  ;;  %v340_v42 = vor.u32 %v339_v10, %v335_v26 }
  0x40   : > { %v1603_v45 = vsel %vm3849_vm7, %v2948_v13, %v1602_v62  ;;  %v1606_v43 = vsel %vm3849_vm7, %v1604_v22, %v1605_v63  ;;  %v350_v46 = vrot.slane %v348_v24, 4  ;;  %v357_v48 = vshll.u32 %v3854_v4, 16  ;;  %v3884_v62 = vld [vmem:[%s3655_s5 + $0x4c] sm:$0xf] }
  0x41   : > { %v353_v47 = vrot.slane %v351_v28, 5  ;;  %3246 = vmatmul.mubr.msk.bf16.gmra.mrb[4].mxu0 %vm445_vm3, %v2927_v34  ;;  %v336_v49 = vsel %vm3694_vm4, %v331_v40, %v335_v26  ;;  %v341_v37 = vrot.slane %v340_v42, 4  ;;  %v2957_v15 = vcombine.low %v1603_v45, %v1606_v43  ;;  %v3906_v28 = vld [vmem:[%s3655_s5 + $0x54] sm:$0xf]  ;;  %v3917_v34 = vld [vmem:[%s4567_s1 + $0xe] sm:$0x3] }
  0x42   : > { %v361_v51 = vshrl.u32 %v3854_v4, 16  ;;  %v359_v53 = vrot.slane %v357_v48, 5  ;;  %v367_v63 = vshll.u32 %v3857_v18, 16  ;;  %v2949_v54 = vrot.slane %v2941_v17, 9 }
  0x43   : > { %v354_v16 = vor.u32 %v353_v47, %v350_v46  ;;  %v346_v59 = vsel %vm3694_vm4, %v341_v37, %v345_v12  ;;  %3259 = vmatprep.mubr.msk.bf16.mxu0 %vm445_vm3, %v2957_v15  ;;  %v1613_v2 = vsel %vm3849_vm7, %v3750_v35, %v1612_v33  ;;  %v372_v26 = vshrl.u32 %v3868_v30, 16  ;;  %v2942_v12 = vld [vmem:[%s3655_s5 + $0x24] sm:$0xe]  ;;  %v3922_v37 = vld [vmem:[%s3655_s5 + $0x58] sm:$0xf] }
  0x44   : > { %v363_v0 = vrot.slane %v361_v51, 4  ;;  %v2811_v9 = vcombine.low %v336_v49, %v346_v59  ;;  %v369_v13 = vrot.slane %v367_v63, 5  ;;  %v1610_v17 = vsel %vm3849_vm7, %v2949_v54, %v1609_v25  ;;  %v3931_v54 = vld [vmem:[%s3655_s5 + $0x5c] sm:$0x1] }
  0x45   : > { %v355_v10 = vrot.slane %v354_v16, 4  ;;  %v2958_v22 = vcombine.low %v1610_v17, %v1613_v2  ;;  %v374_v24 = vrot.slane %v372_v26, 4  ;;  %v375_v1 = vshll.u32 %v3868_v30, 16 }
  0x46   : > { %v364_v20 = vor.u32 %v363_v0, %v359_v53  ;;  %3177 = vmatprep.mubr.msk.bf16.mxu1 %vm445_vm3, %v2811_v9  ;;  %v381_v35 = vshll.u32 %v3884_v62, 16  ;;  %v385_v60 = vshrl.u32 %v3884_v62, 16  ;;  %v391_v25 = vshll.u32 %v3888_v55, 16 }
  0x47   : > { %v360_v33 = vsel %vm3694_vm4, %v355_v10, %v359_v53  ;;  %v377_v42 = vrot.slane %v375_v1, 5  ;;  %v2950_v45 = vrot.slane %v2942_v12, 9  ;;  %v1616_v43 = vrot.slane %v3763_v52, 5  ;;  %v2943_v10 = vld [vmem:[%s3655_s5 + $0x30] sm:$0xe] }
  0x48   : > { %v365_v40 = vrot.slane %v364_v20, 4  ;;  %v383_v46 = vrot.slane %v381_v35, 5  ;;  %v387_v47 = vrot.slane %v385_v60, 4  ;;  %v393_v48 = vrot.slane %v391_v25, 5 }
  0x49   : > { %v1619_v49 = vrot.slane %v3775_v61, 5  ;;  %3260 = vmatmul.mubr.msk.bf16.vlgmr.msra.gmra.mrb[0].mxu0 %vm445_vm3, %v2958_v22  ;;  %v378_v51 = vor.u32 %v377_v42, %v374_v24  ;;  %v1617_v16 = vsel %vm3849_vm7, %v2950_v45, %v1616_v43  ;;  %v1618_v53 = vrot.slane %v1616_v43, 4  ;;  %v3952_v42 = vld [vmem:[%s3655_s5 + $0x40] sm:$0xf]  ;;  %v3955_v45 = vld [vmem:[%s3655_s5 + $0x44] sm:$0x1] }
  0x4a   : > { %v370_v15 = vsel %vm3694_vm4, %v365_v40, %v369_v13  ;;  %3276 = vmatpush3.bf16.msra.mxu0 %v3706_v41  ;;  %v388_v52 = vor.u32 %v387_v47, %v383_v46  ;;  %v396_v61 = vshrl.u32 %v3906_v28, 16  ;;  %v399_v59 = vshll.u32 %v3906_v28, 16 }
  0x4b   : > { %v2812_v63 = vcombine.low %v360_v33, %v370_v15  ;;  %v379_v0 = vrot.slane %v378_v51, 4  ;;  %v1620_v2 = vsel %vm3849_vm7, %v1618_v53, %v1619_v49  ;;  %v405_v26 = vshll.u32 %v3922_v37, 16  ;;  %3467 = vmatprep.subr.msk.bf16.mxu0 %vm470_vm0, %v3917_v34  ;;  %v2944_v33 = vld [vmem:[%s3655_s5 + $0x3c] sm:$0xe] }
  0x4c   : > { %v409_v9 = vshrl.u32 %v3922_v37, 16  ;;  %v389_v41 = vrot.slane %v388_v52, 4  ;;  %v2959_v13 = vcombine.low %v1617_v16, %v1620_v2  ;;  %v398_v17 = vrot.slane %v396_v61, 4  ;;  %v2945_v2 = vld [vmem:[%s3655_s5 + $0x48] sm:$0xe] }
  0x4d   : > { %3178 = vmatmul.mubr.msk.bf16.gmra.mrb[8].mxu1 %vm445_vm3, %v2812_v63  ;;  %v401_v12 = vrot.slane %v399_v59, 5  ;;  %v384_v20 = vsel %vm3694_vm4, %v379_v0, %v383_v46  ;;  %v407_v22 = vrot.slane %v405_v26, 5  ;;  %v415_v1 = vshll.u32 %v3931_v54, 16  ;;  %v3970_v59 = vld [vmem:[%s3655_s5 + $0x4c] sm:$0xf] }
  0x4e   : > { %v411_v24 = vrot.slane %v409_v9, 4  ;;  %v394_v35 = vsel %vm3694_vm4, %v389_v41, %v393_v48  ;;  %3263 = vmatprep.mubr.msk.bf16.mxu0 %vm445_vm3, %v2959_v13  ;;  %v2951_v25 = vrot.slane %v2943_v10, 9  ;;  %v1623_v40 = vrot.slane %v3805_v50, 5  ;;  %v3973_v0 = vld [vmem:[%s3655_s5 + $0x50] sm:$0x1] }
  0x4f   : > { %v402_v60 = vor.u32 %v401_v12, %v398_v17  ;;  %v2813_v43 = vcombine.low %v384_v20, %v394_v35  ;;  %v417_v47 = vrot.slane %v415_v1, 5  ;;  %v1626_v49 = vrot.slane %v3815_v58, 5  ;;  %v3981_v17 = vld [vmem:[%s3655_s5 + $0x58] sm:$0xf]  ;;  %v3984_v12 = vld [vmem:[%s3655_s5 + $0x5c] sm:$0x1] }
  0x50   : > { %v412_v46 = vor.u32 %v411_v24, %v407_v22  ;;  %v1624_v48 = vsel %vm3849_vm7, %v2951_v25, %v1623_v40  ;;  %v1625_v51 = vrot.slane %v1623_v40, 4  ;;  %v2952_v16 = vrot.slane %v2944_v33, 9  ;;  %4579 = vst [vmem:[#allocation2_spill] sm:$0xff] %v3984_v12  ;;  %v3994_v35 = vld [vmem:[%s3655_s5 + $0x64] sm:$0xf] }
  0x51   : > { %v403_v15 = vrot.slane %v402_v60, 4  ;;  %3181 = vmatprep.mubr.msk.bf16.mxu1 %vm445_vm3, %v2813_v43  ;;  %v1630_v53 = vrot.slane %v3952_v42, 5  ;;  %v1633_v63 = vrot.slane %v3955_v45, 5  ;;  %v2823_v61 = vcombine.low %v3658_v6, %v3661_v7  ;;  %v2946_v6 = vld [vmem:[%s3655_s5 + $0x54] sm:$0xe]  ;;  %4580 = vst [vmem:[#allocation3_spill] sm:$0xff] %v3994_v35 }
  0x52   : > { %v413_v50 = vrot.slane %v412_v46, 4  ;;  %v1627_v58 = vsel %vm3849_vm7, %v1625_v51, %v1626_v49  ;;  %v1637_v24 = vrot.slane %v3970_v59, 5  ;;  %v1640_v1 = vrot.slane %v3973_v0, 5  ;;  %v3997_v60 = vld [vmem:[%s3655_s5 + $0x68] sm:$0x1] }
  0x53   : > { %v408_v52 = vsel %vm3694_vm4, %v403_v15, %v407_v22  ;;  %v2960_v9 = vcombine.low %v1624_v48, %v1627_v58  ;;  %v1631_v10 = vsel %vm3849_vm7, %v2952_v16, %v1630_v53  ;;  %v1632_v41 = vrot.slane %v1630_v53, 4  ;;  %4581 = vst [vmem:[#allocation4_spill] sm:$0xff] %v3997_v60 }
  0x54   : > { %v418_v26 = vsel %vm3694_vm4, %v413_v50, %v417_v47  ;;  %v2953_v22 = vrot.slane %v2945_v2, 9  ;;  %v1639_v40 = vrot.slane %v1637_v24, 4  ;;  %v2954_v43 = vrot.slane %v2946_v6, 9  ;;  %v2947_v47 = vld [vmem:[%s3655_s5 + $0x60] sm:$0xe] }
  0x55   : > { %v2814_v13 = vcombine.low %v408_v52, %v418_v26  ;;  %3264 = vmatmul.mubr.msk.bf16.gmra.mrb[4].mxu0 %vm445_vm3, %v2960_v9  ;;  %v1634_v20 = vsel %vm3849_vm7, %v1632_v41, %v1633_v63  ;;  %v1644_v46 = vrot.slane %v3981_v17, 5  ;;  %v771_v49 = vrot.slane %v3699_v36, 5  ;;  %v737_v2 = vld [vmem:[%s3655_s5 + $0x18] sm:$0xe]  ;;  %v4029_v6 = vld [vmem:[%s4567_s1 + $0x6] sm:$0x3] }
  0x56   : > { %v2961_v33 = vcombine.low %v1631_v10, %v1634_v20  ;;  %v1638_v25 = vsel %vm3849_vm7, %v2953_v22, %v1637_v24  ;;  %v1647_v15 = vrot.slane %v3984_v12, 5  ;;  %v1641_v48 = vsel %vm3849_vm7, %v1639_v40, %v1640_v1  ;;  %v739_v1 = vld [vmem:[%s3655_s5 + $0x30] sm:$0xe] }
  0x57   : > { %3182 = vmatmul.mubr.msk.bf16.gmra.mrb[12].mxu1 %vm445_vm3, %v2814_v13  ;;  %v1645_v51 = vsel %vm3849_vm7, %v2954_v43, %v1644_v46  ;;  %v1646_v16 = vrot.slane %v1644_v46, 4  ;;  %v1651_v50 = vrot.slane %v3994_v35, 5  ;;  %v2824_v53 = vcombine.low %v3690_v31, %v3699_v36  ;;  %v738_v36 = vld [vmem:[%s3655_s5 + $0x24] sm:$0xe]  ;;  %v4303_v12 = vld [vmem:[%s3655_s5 + $0x70] sm:$0xf] }
  0x58   : > { %3187 = vmatprep.mubr.msk.bf16.mxu1 %vm445_vm3, %v2823_v61  ;;  %3267 = vmatprep.mubr.msk.bf16.mxu0 %vm445_vm3, %v2961_v33  ;;  %v2962_v63 = vcombine.low %v1638_v25, %v1641_v48  ;;  %v2955_v52 = vrot.slane %v2947_v47, 9  ;;  %v1654_v58 = vrot.slane %v3997_v60, 5  ;;  %v736_v61 = vld [vmem:[%s3655_s5 + $0xc] sm:$0xe]  ;;  %v774_v26 = vrot.slane %v3709_v44, 5 }
  0x59   : > { %v2825_v9 = vcombine.low %v3738_v21, %v3745_v27  ;;  %v1648_v10 = vsel %vm3849_vm7, %v1646_v16, %v1647_v15  ;;  %v1653_v41 = vrot.slane %v1651_v50, 4  ;;  %v869_v13 = vsel %vm470_vm0, %v3769_v57, 0  ;;  %v3515_v16 = vld [vmem:[%s3655_s5 + $0x18] sm:$0xff]   ;;  %v4275_v60 = vld [vmem:[%s3655_s5 + $0x64] sm:$0xf] }
  0x5a   : > { %v2963_v31 = vcombine.low %v1645_v51, %v1648_v10  ;;  %v2840_v44 = vrot.slane %v736_v61, 9  ;;  %v773_v20 = vrot.slane %v771_v49, 4  ;;  %v2841_v21 = vrot.slane %v737_v2, 9  ;;  %4582 = vst [vmem:[#allocation5_spill] sm:$0xff] %v4275_v60 }
  0x5b   : > { %v1652_v22 = vsel %vm3849_vm7, %v2955_v52, %v1651_v50  ;;  %v1655_v57 = vsel %vm3849_vm7, %v1653_v41, %v1654_v58  ;;  %v778_v24 = vrot.slane %v3745_v27, 5  ;;  %v781_v40 = vrot.slane %v3753_v38, 5 }
  0x5c   : > { %v4042_v33 = vsel %vm3849_vm7, %v2840_v44, %v771_v49  ;;  %v4046_v25 = vsel %vm3849_vm7, %v773_v20, %v774_v26  ;;  %v2842_v43 = vrot.slane %v738_v36, 9  ;;  %v2964_v49 = vcombine.low %v1652_v22, %v1655_v57  ;;  %v3008_v26 = vld [vmem:[%s3655_s5 + $0x18] sm:$0xf]  ;;  %v3517_v57 = vld [vmem:[%s3655_s5 + $0x24] sm:$0xff]  }
  0x5d   : > { %3268 = vmatmul.mubr.msk.bf16.gmra.mrb[8].mxu0 %vm445_vm3, %v2962_v63  ;;  %v2849_v27 = vcombine.low %v4042_v33, %v4046_v25  ;;  %v4055_v46 = vsel %vm3849_vm7, %v2841_v21, %v778_v24  ;;  %v780_v47 = vrot.slane %v778_v24, 4  ;;  %v785_v15 = vrot.slane %v3785_v19, 5 }
  0x5e   : > { %3271 = vmatprep.mubr.msk.bf16.mxu0 %vm445_vm3, %v2963_v31  ;;  %v788_v48 = vrot.slane %v3795_v29, 5  ;;  %v2843_v38 = vrot.slane %v739_v1, 9  ;;  %v2826_v51 = vcombine.low %v3782_v11, %v3785_v19  ;;  %v795_v63 = vrot.slane %v3831_v39, 5  ;;  %v740_v19 = vld [vmem:[%s3655_s5 + $0x3c] sm:$0xe] }
  0x5f   : > { %3188 = vmatmul.mubr.msk.bf16.vlgmr.msra.gmra.mrb[0].mxu1 %vm445_vm3, %v2824_v53  ;;  %v4064_v50 = vsel %vm3849_vm7, %v780_v47, %v781_v40  ;;  %v792_v53 = vrot.slane %v3826_v23, 5  ;;  %v2827_v52 = vcombine.low %v3820_v14, %v3826_v23  ;;  %v4074_v58 = vsel %vm3849_vm7, %v2842_v43, %v785_v15  ;;  %v735_v14 = vld [vmem:[%s3655_s5] sm:$0xe]  ;;  %v4102_v31 = vld [vmem:[%s3655_s5 + $0x1c] sm:$0xf] }
  0x60   : > { %3204 = vmatpush3.bf16.msra.mxu1 %v869_v13  ;;  %3191 = vmatprep.mubr.msk.bf16.mxu1 %vm445_vm3, %v2825_v9  ;;  %v2850_v29 = vcombine.low %v4055_v46, %v4064_v50  ;;  %v787_v11 = vrot.slane %v785_v15, 4  ;;  %v764_v61 = vrot.slane %v3661_v7, 5  ;;  %v2844_v10 = vrot.slane %v740_v19, 9  ;;  %v741_v1 = vld [vmem:[%s3655_s5 + $0x48] sm:$0xe] }
  0x61   : > { %3462 = vmatprep.subr.msk.bf16.mxu1 %vm470_vm0, %v4029_v6  ;;  %v4080_v2 = vsel %vm3849_vm7, %v2843_v38, %v792_v53  ;;  %v794_v39 = vrot.slane %v792_v53, 4  ;;  %v767_v41 = vrot.slane %v3664_v8, 5  ;;  %v2839_v36 = vrot.slane %v735_v14, 9  ;;  %v4128_v38 = vld [vmem:[%s4567_s1 + $0x10] sm:$0x3] }
  0x62   : > { %v4086_v23 = vsel %vm3849_vm7, %v787_v11, %v788_v48  ;;  %v766_v44 = vrot.slane %v764_v61, 4  ;;  %v799_v20 = vrot.slane %v3854_v4, 5  ;;  %v802_v21 = vrot.slane %v3857_v18, 5  ;;  %v4149_v14 = vld [vmem:[%s3655_s5 + $0x28] sm:$0xf] }
  0x63   : > { %v4095_v9 = vsel %vm3849_vm7, %v794_v39, %v795_v63  ;;  %v2828_v22 = vcombine.low %v3843_v56, %v3854_v4  ;;  %v2049_v24 = vshrl.u32 %v3008_v26, 16  ;;  %v2052_v8 = vshll.u32 %v3008_v26, 16  ;;  %v3519_v4 = vld [vmem:[%s3655_s5 + $0x30] sm:$0xff]   ;;  %v4251_v46 = vld [vmem:[%s3655_s5 + $0x44] sm:$0x1] }
  0x64   : > { %v2058_v40 = vshll.u32 %v4102_v31, 16  ;;  %v2062_v43 = vshrl.u32 %v4102_v31, 16  ;;  %v4114_v47 = vsel %vm3849_vm7, %v2844_v10, %v799_v20  ;;  %v2291_v18 = vsel %vm470_vm0, %v3917_v34, 0  ;;  %v3026_v7 = vld [vmem:[%s3655_s5 + $0x60] sm:$0xf] }
  0x65   : > { %3272 = vmatmul.mubr.msk.bf16.gmra.mrb[12].mxu0 %vm445_vm3, %v2964_v49  ;;  %v801_v49 = vrot.slane %v799_v20, 4  ;;  %v2829_v56 = vcombine.low %v3868_v30, %v3884_v62  ;;  %v765_v15 = vsel %vm3849_vm7, %v2839_v36, %v764_v61  ;;  %v768_v48 = vsel %vm3849_vm7, %v766_v44, %v767_v41  ;;  %v4136_v30 = vld [vmem:[%s3655_s5 + $0x20] sm:$0x1]  ;;  %v3011_v61 = vld [vmem:[%s3655_s5 + $0x24] sm:$0xf] }
  0x66   : > { %3277 = vmatprep.mubr.msk.bf16.mxu0 %vm445_vm3, %v3515_v16  ;;  %v2845_v34 = vrot.slane %v741_v1, 9  ;;  %v2051_v16 = vrot.slane %v2049_v24, 4  ;;  %v2054_v53 = vrot.slane %v2052_v8, 5  ;;  %v4142_v11 = vrot.slane %v2058_v40, 5  ;;  %v742_v44 = vld [vmem:[%s3655_s5 + $0x54] sm:$0xe] }
  0x67   : > { %3192 = vmatmul.mubr.msk.bf16.gmra.mrb[4].mxu1 %vm445_vm3, %v2826_v51  ;;  %v4132_v51 = vsel %vm3849_vm7, %v801_v49, %v802_v21  ;;  %v2064_v19 = vrot.slane %v2062_v43, 4  ;;  %v809_v39 = vrot.slane %v3888_v55, 5  ;;  %v2830_v10 = vcombine.low %v3906_v28, %v3922_v37  ;;  %v3014_v55 = vld [vmem:[%s3655_s5 + $0x30] sm:$0xf]  ;;  %v3521_v20 = vld [vmem:[%s3655_s5 + $0x3c] sm:$0xff]   ;;  %v3522_v1 = vld [vmem:[%s3655_s5 + $0x48] sm:$0xff]  }
  0x68   : > { %3195 = vmatprep.mubr.msk.bf16.mxu1 %vm445_vm3, %v2827_v52  ;;  %v806_v52 = vrot.slane %v3884_v62, 5  ;;  %v2848_v41 = vcombine.low %v765_v15, %v768_v48  ;;  %v2068_v36 = vshll.u32 %v4136_v30, 16  ;;  %v2055_v21 = vor.u32 %v2054_v53, %v2051_v16  ;;  %v4168_v8 = vld [vmem:[%s3655_s5 + $0x34] sm:$0xf] }
  0x69   : > { %v2065_v28 = vor.u32 %v2064_v19, %v4142_v11  ;;  %v2082_v40 = vshll.u32 %v4149_v14, 16  ;;  %v2086_v43 = vshrl.u32 %v4149_v14, 16  ;;  %v813_v15 = vrot.slane %v3922_v37, 5 }
  0x6a   : > { %v4153_v62 = vsel %vm3849_vm7, %v2845_v34, %v806_v52  ;;  %v808_v26 = vrot.slane %v806_v52, 4  ;;  %v2106_v48 = vshll.u32 %v4168_v8, 16  ;;  %v2110_v34 = vshrl.u32 %v4168_v8, 16 }
  0x6b   : > { %v816_v16 = vrot.slane %v3931_v54, 5  ;;  %v2056_v53 = vrot.slane %v2055_v21, 4  ;;  %v2070_v52 = vrot.slane %v2068_v36, 5  ;;  %v2066_v37 = vrot.slane %v2065_v28, 4  ;;  %v4191_v36 = vld [vmem:[%s3655_s5 + $0x2c] sm:$0x1] }
  0x6c   : > { %v4165_v24 = vsel %vm3849_vm7, %v808_v26, %v809_v39  ;;  %v4187_v26 = vrot.slane %v2082_v40, 5  ;;  %v4198_v21 = vld [vmem:[%s3655_s5 + $0x38] sm:$0x1]  ;;  %v1071_v28 = vsel %vm470_vm0, %v4029_v6, 0 }
  0x6d   : > { %3278 = vmatmul.mubr.msk.bf16.vlgmr.msra.gmra.mrb[0].mxu0 %vm445_vm3, %v3517_v57  ;;  %v2076_v57 = vshll.u32 %v3011_v61, 16  ;;  %v3523_v40 = vld [vmem:[%s3655_s5 + $0x54] sm:$0xff]  }
  0x6e   : > { %3294 = vmatpush3.bf16.msra.mxu0 %v2291_v18  ;;  %3281 = vmatprep.mubr.msk.bf16.mxu0 %vm445_vm3, %v3519_v4  ;;  %v2097_v18 = vshrl.u32 %v3014_v55, 16  ;;  %v2846_v4 = vrot.slane %v742_v44, 9 }
  0x6f   : > { %3196 = vmatmul.mubr.msk.bf16.gmra.mrb[8].mxu1 %vm445_vm3, %v2828_v22  ;;  %3468 = vmatprep.subr.msk.bf16.mxu0 %vm470_vm0, %v4128_v38  ;;  %v2073_v22 = vshrl.u32 %v3011_v61, 16  ;;  %v815_v61 = vrot.slane %v813_v15, 4  ;;  %v2078_v54 = vrot.slane %v2076_v57, 5  ;;  %v2112_v57 = vrot.slane %v2110_v34, 4  ;;  %v3020_v34 = vld [vmem:[%s3655_s5 + $0x48] sm:$0xf] }
  0x70   : > { %3199 = vmatprep.mubr.msk.bf16.mxu1 %vm445_vm3, %v2829_v56  ;;  %v2100_v56 = vshll.u32 %v3014_v55, 16  ;;  %v4183_v19 = vsel %vm3849_vm7, %v2846_v4, %v813_v15  ;;  %v2088_v55 = vrot.slane %v2086_v43, 4  ;;  %v2099_v44 = vrot.slane %v2097_v18, 4  ;;  %v4209_v43 = vld [vmem:[%s3655_s5 + $0x40] sm:$0xf] }
  0x71   : > { %v2075_v39 = vrot.slane %v2073_v22, 4  ;;  %v4200_v22 = vrot.slane %v2106_v48, 5  ;;  %v3524_v18 = vld [vmem:[%s3655_s5 + $0x60] sm:$0xff]   ;;  %v2071_v4 = vsel %vm3694_vm4, %v2066_v37, %v2070_v52  ;;  %v2092_v48 = vshll.u32 %v4191_v36, 16 }
  0x72   : > { %v2145_v52 = vshrl.u32 %v3020_v34, 16  ;;  %v2148_v37 = vshll.u32 %v3020_v34, 16 }
  0x73   : > { %v2079_v15 = vor.u32 %v2078_v54, %v2075_v39  ;;  %v2113_v63 = vor.u32 %v2112_v57, %v4200_v22  ;;  %v3023_v57 = vld [vmem:[%s3655_s5 + $0x54] sm:$0xf] }
  0x74   : > { %v2147_v50 = vrot.slane %v2145_v52, 4  ;;  %v2172_v34 = vshll.u32 %v3023_v57, 16 }
  0x75   : > { %3282 = vmatmul.mubr.msk.bf16.gmra.mrb[4].mxu0 %vm445_vm3, %v3521_v20  ;;  %v2102_v20 = vrot.slane %v2100_v56, 5  ;;  %v2061_v56 = vsel %vm3694_vm4, %v2056_v53, %v4142_v11  ;;  %v2130_v11 = vshll.u32 %v4209_v43, 16  ;;  %v2134_v53 = vshrl.u32 %v4209_v43, 16 }
  0x76   : > { %3285 = vmatprep.mubr.msk.bf16.mxu0 %vm445_vm3, %v3522_v1  ;;  %v2116_v1 = vshll.u32 %v4198_v21, 16  ;;  %v3033_v54 = vcombine.low %v2061_v56, %v2071_v4  ;;  %v2114_v56 = vrot.slane %v2113_v63, 4  ;;  %v4256_v63 = vld [vmem:[%s3655_s5 + $0x50] sm:$0x1] }
  0x77   : > { %3200 = vmatmul.mubr.msk.bf16.gmra.mrb[12].mxu1 %vm445_vm3, %v2830_v10  ;;  %v4195_v10 = vsel %vm3849_vm7, %v815_v61, %v816_v16  ;;  %v4220_v16 = vld [vmem:[%s3655_s5 + $0x4c] sm:$0xf]  ;;  %v2089_v61 = vor.u32 %v2088_v55, %v4187_v26  ;;  %v2103_v6 = vor.u32 %v2102_v20, %v2099_v44  ;;  %v2080_v55 = vrot.slane %v2079_v15, 4 }
  0x78   : > { %3205 = vmatprep.mubr.msk.bf16.mxu1 %vm445_vm3, %v2848_v41  ;;  %v3017_v41 = vld [vmem:[%s3655_s5 + $0x3c] sm:$0xf]  ;;  %v2154_v39 = vshll.u32 %v4220_v16, 16  ;;  %v2094_v44 = vrot.slane %v2092_v48, 5  ;;  %v2158_v20 = vshrl.u32 %v4220_v16, 16  ;;  %v2118_v33 = vrot.slane %v2116_v1, 5 }
  0x79   : > { %v2121_v49 = vshrl.u32 %v3017_v41, 16  ;;  %v2124_v13 = vshll.u32 %v3017_v41, 16  ;;  %v2090_v41 = vrot.slane %v2089_v61, 4  ;;  %v4244_v15 = vrot.slane %v2130_v11, 5 }
  0x7a   : > { %v2136_v48 = vrot.slane %v2134_v53, 4  ;;  %v2169_v1 = vshrl.u32 %v3023_v57, 16  ;;  %v1340_v11 = vshll.u32 %v3970_v59, 16  ;;  %v2085_v53 = vsel %vm3694_vm4, %v2080_v55, %v4187_v26 }
  0x7b   : > { %v2123_v25 = vrot.slane %v2121_v49, 4  ;;  %v2126_v4 = vrot.slane %v2124_v13, 5  ;;  %v4253_v49 = vrot.slane %v2154_v39, 5  ;;  %v2160_v13 = vrot.slane %v2158_v20, 4 }
  0x7c   : > { %v2095_v52 = vsel %vm3694_vm4, %v2090_v41, %v2094_v44  ;;  %v2137_v57 = vor.u32 %v2136_v48, %v4244_v15  ;;  %v2119_v26 = vsel %vm3694_vm4, %v2114_v56, %v2118_v33  ;;  %v2171_v44 = vrot.slane %v2169_v1, 4  ;;  %v4294_v56 = vld [vmem:[%s3655_s5 + $0x5c] sm:$0x1] }
  0x7d   : > { %3286 = vmatmul.mubr.msk.bf16.gmra.mrb[8].mxu0 %vm445_vm3, %v3523_v40  ;;  %v2104_v40 = vrot.slane %v2103_v6, 4  ;;  %v2127_v20 = vor.u32 %v2126_v4, %v2123_v25  ;;  %v2161_v41 = vor.u32 %v2160_v13, %v4253_v49  ;;  %v4584_v33 = vcombine.low %v4080_v2, %v4095_v9 }
  0x7e   : > { %3289 = vmatprep.mubr.msk.bf16.mxu0 %vm445_vm3, %v3524_v18  ;;  %v3525_v18 = vld [vmem:[%s3655_s5 + $0x6c] sm:$0xff]   ;;  %v2193_v4 = vshrl.u32 %v3026_v7, 16  ;;  %v1344_v48 = vshrl.u32 %v3970_v59, 16  ;;  %v3034_v13 = vcombine.low %v2085_v53, %v2095_v52 }
  0x7f   : > { %3206 = vmatmul.mubr.msk.bf16.vlgmr.msra.gmra.mrb[0].mxu1 %vm445_vm3, %v2849_v27  ;;  %v4241_v27 = vld [vmem:[%s3655_s5 + $0x58] sm:$0xf]  ;;  %v2109_v39 = vsel %vm3694_vm4, %v2104_v40, %v4200_v22  ;;  %v4583_v22 = vcombine.low %v4074_v58, %v4086_v23  ;;  %v2174_v40 = vrot.slane %v2172_v34, 5  ;;  %v2196_v58 = vshll.u32 %v3026_v7, 16 }
  0x80   : > { %3222 = vmatpush3.bf16.msra.mxu1 %v1071_v28  ;;  %3209 = vmatprep.mubr.msk.bf16.mxu1 %vm445_vm3, %v2850_v29  ;;  %v3534_v28 = vld [vmem:[%s4567_s1 + $0x8] sm:$0x3]  ;;  %v2150_v29 = vrot.slane %v2148_v37, 5  ;;  %v2178_v61 = vshll.u32 %v4241_v27, 16  ;;  %v2182_v6 = vshrl.u32 %v4241_v27, 16  ;;  %v2545_v37 = vsel %vm470_vm0, %v4128_v38, 0 }
  0x81   : > { %3464 = vmatprep.subr.msk.bf16.mxu1 %vm470_vm0, %v3534_v28  ;;  %v2140_v28 = vshll.u32 %v4251_v46, 16  ;;  %v2164_v38 = vshll.u32 %v4256_v63, 16  ;;  %v2202_v23 = vshll.u32 %v4275_v60, 16  ;;  %v3035_v34 = vcombine.low %v2109_v39, %v2119_v26 }
  0x82   : > { %v2151_v55 = vor.u32 %v2150_v29, %v2147_v50  ;;  %v4287_v25 = vrot.slane %v2178_v61, 5  ;;  %v2128_v50 = vrot.slane %v2127_v20, 4  ;;  %v2138_v29 = vrot.slane %v2137_v57, 4 }
  0x83   : > { %v2142_v1 = vrot.slane %v2140_v28, 5  ;;  %v2166_v9 = vrot.slane %v2164_v38, 5  ;;  %v2162_v61 = vrot.slane %v2161_v41, 4  ;;  %v2188_v7 = vshll.u32 %v4294_v56, 16  ;;  %v4315_v28 = vld [vmem:[%s3655_s5 + $0x68] sm:$0x1] }
  0x84   : > { %v2152_v2 = vrot.slane %v2151_v55, 4  ;;  %v2195_v35 = vrot.slane %v2193_v4, 4  ;;  %v4305_v59 = vrot.slane %v2202_v23, 5  ;;  %v4307_v57 = vrot.slane %v1340_v11, 5 }
  0x85   : > { %3290 = vmatmul.mubr.msk.bf16.gmra.mrb[12].mxu0 %vm445_vm3, %v3525_v18  ;;  %v2184_v18 = vrot.slane %v2182_v6, 4  ;;  %v2175_v6 = vor.u32 %v2174_v40, %v2171_v44  ;;  %v1346_v53 = vrot.slane %v1344_v48, 4  ;;  %v2133_v52 = vsel %vm3694_vm4, %v2128_v50, %v4244_v15 }
  0x86   : > { %3295 = vmatprep.mubr.msk.bf16.mxu0 %vm445_vm3, %v3033_v54  ;;  %v2206_v54 = vshrl.u32 %v4275_v60, 16  ;;  %v2198_v60 = vrot.slane %v2196_v58, 5  ;;  %v2143_v39 = vsel %vm3694_vm4, %v2138_v29, %v2142_v1  ;;  %v2226_v38 = vshll.u32 %v4303_v12, 16  ;;  %v3526_v1 = vld [vmem:[%s3655_s5 + $0xc] sm:$0xff]  }
  0x87   : > { %3210 = vmatmul.mubr.msk.bf16.gmra.mrb[4].mxu1 %vm445_vm3, %v4583_v22  ;;  %v2185_v22 = vor.u32 %v2184_v18, %v4287_v25  ;;  %v2230_v44 = vshrl.u32 %v4303_v12, 16  ;;  %v4585_v11 = vcombine.low %v4114_v47, %v4132_v51  ;;  %v2157_v15 = vsel %vm3694_vm4, %v2152_v2, %v4253_v49 }
  0x88   : > { %3213 = vmatprep.mubr.msk.bf16.mxu1 %vm445_vm3, %v4584_v33  ;;  %v3029_v33 = vld [vmem:[%s3655_s5 + $0x6c] sm:$0xf]  ;;  %v2208_v20 = vrot.slane %v2206_v54, 4  ;;  %v2167_v41 = vsel %vm3694_vm4, %v2162_v61, %v2166_v9  ;;  %v2176_v40 = vrot.slane %v2175_v6, 4  ;;  %v2190_v18 = vrot.slane %v2188_v7, 5 }
  0x89   : > { %v2217_v26 = vshrl.u32 %v3029_v33, 16  ;;  %v2220_v55 = vshll.u32 %v3029_v33, 16  ;;  %v4586_v4 = vcombine.low %v4153_v62, %v4165_v24  ;;  %v2186_v47 = vrot.slane %v2185_v22, 4  ;;  %v2914_v22 = vld [vmem:[%s3655_s5 + $0x48] sm:$0xf] }
  0x8a   : > { %v2199_v51 = vor.u32 %v2198_v60, %v2195_v35  ;;  %v2212_v49 = vshll.u32 %v4315_v28, 16  ;;  %v1347_v58 = vor.u32 %v1346_v53, %v4307_v57  ;;  %v1350_v23 = vshll.u32 %v3973_v0, 16  ;;  %v4344_v60 = vld [vmem:[%s3655_s5 + $0x74] sm:$0x1] }
  0x8b   : > { %v3036_v54 = vcombine.low %v2133_v52, %v2143_v39  ;;  %v2219_v48 = vrot.slane %v2217_v26, 4  ;;  %v2222_v62 = vrot.slane %v2220_v55, 5  ;;  %v4338_v24 = vrot.slane %v2226_v38, 5 }
  0x8c   : > { %v2232_v50 = vrot.slane %v2230_v44, 4  ;;  %v3037_v29 = vcombine.low %v2157_v15, %v2167_v41  ;;  %v2181_v35 = vsel %vm3694_vm4, %v2176_v40, %v4287_v25  ;;  %v2200_v0 = vrot.slane %v2199_v51, 4  ;;  %v3528_v51 = vld [vmem:[%s3655_s5 + $0x24] sm:$0xff]  }
  0x8d   : > { %3296 = vmatmul.mubr.msk.bf16.vlgmr.msra.gmra.mrb[0].mxu0 %vm445_vm3, %v3034_v13  ;;  %v2191_v13 = vsel %vm3694_vm4, %v2186_v47, %v2190_v18  ;;  %v2214_v2 = vrot.slane %v2212_v49, 5  ;;  %v1348_v9 = vrot.slane %v1347_v58, 4  ;;  %v1352_v61 = vrot.slane %v1350_v23, 5 }
  0x8e   : > { %3312 = vmatpush3.bf16.msra.mxu0 %v2545_v37  ;;  %3299 = vmatprep.mubr.msk.bf16.mxu0 %vm445_vm3, %v3035_v34  ;;  %v2209_v37 = vor.u32 %v2208_v20, %v4305_v59  ;;  %v2440_v6 = vrot.slane %v4102_v31, 5  ;;  %v2223_v7 = vor.u32 %v2222_v62, %v2219_v48  ;;  %v2233_v33 = vor.u32 %v2232_v50, %v4338_v24  ;;  %v3049_v20 = vld [vmem:[%s3655_s5 + $0x18] sm:$0xe]  ;;  %v3051_v62 = vld [vmem:[%s3655_s5 + $0x30] sm:$0xe] }
  0x8f   : > { %3214 = vmatmul.mubr.msk.bf16.gmra.mrb[8].mxu1 %vm445_vm3, %v4585_v11  ;;  %v2236_v25 = vshll.u32 %v4344_v60, 16  ;;  %v4587_v53 = vcombine.low %v4183_v19, %v4195_v10  ;;  %v3038_v52 = vcombine.low %v2181_v35, %v2191_v13  ;;  %v2205_v31 = vsel %vm3694_vm4, %v2200_v0, %v4305_v59  ;;  %v3527_v59 = vld [vmem:[%s3655_s5 + $0x18] sm:$0xff]  }
  0x90   : > { %3217 = vmatprep.mubr.msk.bf16.mxu1 %vm445_vm3, %v4586_v4  ;;  %v2210_v34 = vrot.slane %v2209_v37, 4  ;;  %v1331_v26 = vshrl.u32 %v2914_v22, 16  ;;  %v1334_v55 = vshll.u32 %v2914_v22, 16  ;;  %v3057_v19 = vrot.slane %v3049_v20, 9  ;;  %v2911_v4 = vld [vmem:[%s3655_s5 + $0x3c] sm:$0xf] }
  0x91   : > { %v2442_v10 = vrot.slane %v2440_v6, 4  ;;  %v2443_v38 = vrot.slane %v4136_v30, 5  ;;  %v1353_v44 = vsel %vm3694_vm4, %v1348_v9, %v1352_v61  ;;  %v2224_v11 = vrot.slane %v2223_v7, 4  ;;  %v3050_v30 = vld [vmem:[%s3655_s5 + $0x24] sm:$0xe]  ;;  %v3529_v22 = vld [vmem:[%s3655_s5 + $0x30] sm:$0xff]  }
  0x92   : > { %v2215_v39 = vsel %vm3694_vm4, %v2210_v34, %v2214_v2  ;;  %v2234_v15 = vrot.slane %v2233_v33, 4  ;;  %v2238_v41 = vrot.slane %v2236_v25, 5  ;;  %v1333_v40 = vrot.slane %v1331_v26, 4  ;;  %v3530_v20 = vld [vmem:[%s3655_s5 + $0x3c] sm:$0xff]   ;;  %v2917_v26 = vld [vmem:[%s3655_s5 + $0x54] sm:$0xf] }
  0x93   : > { %v3039_v18 = vcombine.low %v2205_v31, %v2215_v39  ;;  %v1336_v47 = vrot.slane %v1334_v55, 5  ;;  %v2441_v37 = vsel %vm3849_vm7, %v3057_v19, %v2440_v6  ;;  %v2444_v49 = vsel %vm3849_vm7, %v2442_v10, %v2443_v38  ;;  %v3053_v38 = vld [vmem:[%s3655_s5 + $0x48] sm:$0xe] }
  0x94   : > { %v2447_v58 = vrot.slane %v4149_v14, 5  ;;  %v2239_v48 = vsel %vm3694_vm4, %v2234_v15, %v2238_v41  ;;  %v2454_v50 = vrot.slane %v4168_v8, 5  ;;  %v1310_v35 = vshll.u32 %v2911_v4, 16 }
  0x95   : > { %3300 = vmatmul.mubr.msk.bf16.gmra.mrb[4].mxu0 %vm445_vm3, %v3036_v54  ;;  %v1337_v23 = vor.u32 %v1336_v47, %v1333_v40  ;;  %v2229_v54 = vsel %vm3694_vm4, %v2224_v11, %v4338_v24  ;;  %v1316_v14 = vshll.u32 %v3952_v42, 16  ;;  %v3058_v24 = vrot.slane %v3050_v30, 9 }
  0x96   : > { %3303 = vmatprep.mubr.msk.bf16.mxu0 %vm445_vm3, %v3037_v29  ;;  %v1307_v29 = vshrl.u32 %v2911_v4, 16  ;;  %v2450_v8 = vrot.slane %v4191_v36, 5  ;;  %v3066_v0 = vcombine.low %v2441_v37, %v2444_v49  ;;  %v2449_v34 = vrot.slane %v2447_v58, 4  ;;  %v3531_v37 = vld [vmem:[%s3655_s5 + $0x48] sm:$0xff]  }
  0x97   : > { %3218 = vmatmul.mubr.msk.bf16.gmra.mrb[12].mxu1 %vm445_vm3, %v4587_v53  ;;  %v1338_v13 = vrot.slane %v1337_v23, 4  ;;  %v3059_v2 = vrot.slane %v3051_v62, 9  ;;  %v3040_v61 = vcombine.low %v2229_v54, %v2239_v48  ;;  %v2456_v6 = vrot.slane %v2454_v50, 4  ;;  %v3532_v23 = vld [vmem:[%s3655_s5 + $0x54] sm:$0xff]  }
  0x98   : > { %3223 = vmatprep.mubr.msk.bf16.mxu1 %vm445_vm3, %v3526_v1  ;;  %v1320_v1 = vshrl.u32 %v3952_v42, 16  ;;  %v2457_v42 = vrot.slane %v4198_v21, 5  ;;  %v1309_v7 = vrot.slane %v1307_v29, 4  ;;  %v1312_v33 = vrot.slane %v1310_v35, 5 }
  0x99   : > { %v1343_v9 = vsel %vm3694_vm4, %v1338_v13, %v4307_v57  ;;  %v4400_v25 = vrot.slane %v1316_v14, 5  ;;  %v2448_v53 = vsel %vm3849_vm7, %v3058_v24, %v2447_v58  ;;  %v2451_v57 = vsel %vm3849_vm7, %v2449_v34, %v2450_v8  ;;  %v3054_v24 = vld [vmem:[%s3655_s5 + $0x54] sm:$0xe]  ;;  %v4588_v8 = vld [vmem:[#allocation5_spill] sm:$0xff] }
  0x9a   : > { %v1322_v36 = vrot.slane %v1320_v1, 4  ;;  %v2455_v21 = vsel %vm3849_vm7, %v3059_v2, %v2454_v50  ;;  %v2461_v31 = vrot.slane %v4209_v43, 5  ;;  %v1326_v39 = vshll.u32 %v3955_v45, 16  ;;  %v2920_v50 = vld [vmem:[%s3655_s5 + $0x60] sm:$0xf] }
  0x9b   : > { %v2458_v55 = vsel %vm3849_vm7, %v2456_v6, %v2457_v42  ;;  %v1313_v19 = vor.u32 %v1312_v33, %v1309_v7  ;;  %v3067_v43 = vcombine.low %v2448_v53, %v2451_v57  ;;  %v2464_v11 = vrot.slane %v4251_v46, 5  ;;  %v4590_v33 = vld [vmem:[#allocation2_spill] sm:$0xff] }
  0x9c   : > { %v1323_v10 = vor.u32 %v1322_v36, %v4400_v25  ;;  %v1355_v15 = vshrl.u32 %v2917_v26, 16  ;;  %v1358_v41 = vshll.u32 %v2917_v26, 16  ;;  %v1364_v40 = vshll.u32 %v3981_v17, 16 }
  0x9d   : > { %3304 = vmatmul.mubr.msk.bf16.gmra.mrb[8].mxu0 %vm445_vm3, %v3038_v52  ;;  %v3052_v52 = vld [vmem:[%s3655_s5 + $0x3c] sm:$0xe]  ;;  %v2463_v4 = vrot.slane %v2461_v31, 4  ;;  %v1328_v47 = vrot.slane %v1326_v39, 5  ;;  %v2471_v58 = vrot.slane %v4256_v63, 5  ;;  %v2475_v63 = vrot.slane %v4241_v27, 5 }
  0x9e   : > { %3307 = vmatprep.mubr.msk.bf16.mxu0 %vm445_vm3, %v3039_v18  ;;  %v3060_v45 = vrot.slane %v3052_v52, 9  ;;  %v3068_v18 = vcombine.low %v2455_v21, %v2458_v55  ;;  %v1324_v49 = vrot.slane %v1323_v10, 4  ;;  %v1357_v46 = vrot.slane %v1355_v15, 4  ;;  %v3055_v27 = vld [vmem:[%s3655_s5 + $0x60] sm:$0xe] }
  0x9f   : > { %3224 = vmatmul.mubr.msk.bf16.vlgmr.msra.gmra.mrb[0].mxu1 %vm445_vm3, %v3527_v59  ;;  %v1368_v59 = vshrl.u32 %v3981_v17, 16  ;;  %v1360_v54 = vrot.slane %v1358_v41, 5  ;;  %v1366_v48 = vrot.slane %v1364_v40, 5  ;;  %v2465_v29 = vsel %vm3849_vm7, %v2463_v4, %v2464_v11  ;;  %v3533_v52 = vld [vmem:[%s3655_s5 + $0x60] sm:$0xff]  }
  0xa0   : > { %3330 = vmatpush3.bf16.msra.mxu1 %v3637_v3  ;;  %3227 = vmatprep.mubr.msk.bf16.mxu1 %vm445_vm3, %v3528_v51  ;;  %v4397_v3 = vcombine.low %v1343_v9, %v1353_v44  ;;  %v2468_v44 = vrot.slane %v4220_v16, 5  ;;  %v3061_v51 = vrot.slane %v3053_v38, 9  ;;  %v1314_v16 = vrot.slane %v1313_v19, 4  ;;  %v4589_v9 = vld [vmem:[#allocation3_spill] sm:$0xff] }
  0xa1   : > { %v1370_v62 = vrot.slane %v1368_v59, 4  ;;  %v2462_v17 = vsel %vm3849_vm7, %v3060_v45, %v2461_v31  ;;  %v1329_v1 = vsel %vm3694_vm4, %v1324_v49, %v1328_v47  ;;  %v1379_v34 = vshrl.u32 %v2920_v50, 16  ;;  %v3056_v47 = vld [vmem:[%s3655_s5 + $0x6c] sm:$0xe]  ;;  %s4501_s5 = scalar_lea.vmem %s4569_s3, %s2802_s28 }
  0xa2   : > { %v2470_v30 = vrot.slane %v2468_v44, 4  ;;  %v2469_v35 = vsel %vm3849_vm7, %v3061_v51, %v2468_v44  ;;  %v1319_v14 = vsel %vm3694_vm4, %v1314_v16, %v4400_v25  ;;  %v1382_v2 = vshll.u32 %v2920_v50, 16 }
  0xa3   : > { %v1392_v6 = vshrl.u32 %v4589_v9, 16  ;;  %v3069_v42 = vcombine.low %v2462_v17, %v2465_v29  ;;  %v1371_v7 = vor.u32 %v1370_v62, %v1366_v48  ;;  %v1374_v25 = vshll.u32 %v4590_v33, 16 }
  0xa4   : > { %v2472_v13 = vsel %vm3849_vm7, %v2470_v30, %v2471_v58  ;;  %v2477_v53 = vrot.slane %v2475_v63, 4  ;;  %v2478_v57 = vrot.slane %v4294_v56, 5  ;;  %v2928_v21 = vcombine.low %v1319_v14, %v1329_v1 }
  0xa5   : > { %3308 = vmatmul.mubr.msk.bf16.gmra.mrb[12].mxu0 %vm445_vm3, %v3040_v61  ;;  %v1388_v61 = vshll.u32 %v4589_v9, 16  ;;  %v3070_v36 = vcombine.low %v2469_v35, %v2472_v13  ;;  %v3063_v31 = vrot.slane %v3055_v27, 9  ;;  %v2485_v26 = vrot.slane %v4315_v28, 5 }
  0xa6   : > { %3313 = vmatprep.mubr.msk.bf16.mxu0 %vm445_vm3, %v3066_v0  ;;  %v2482_v0 = vrot.slane %v4588_v8, 5  ;;  %v1381_v55 = vrot.slane %v1379_v34, 4  ;;  %v1384_v19 = vrot.slane %v1382_v2, 5  ;;  %v1394_v38 = vrot.slane %v1392_v6, 4 }
  0xa7   : > { %3228 = vmatmul.mubr.msk.bf16.gmra.mrb[4].mxu1 %vm445_vm3, %v3529_v22  ;;  %v1361_v22 = vor.u32 %v1360_v54, %v1357_v46  ;;  %v1390_v10 = vrot.slane %v1388_v61, 5  ;;  %v1376_v45 = vrot.slane %v1374_v25, 5  ;;  %v2479_v28 = vsel %vm3849_vm7, %v2477_v53, %v2478_v57 }
  0xa8   : > { %3231 = vmatprep.mubr.msk.bf16.mxu1 %vm445_vm3, %v3530_v20  ;;  %v3062_v20 = vrot.slane %v3054_v24, 9  ;;  %v2484_v39 = vrot.slane %v2482_v0, 4  ;;  %v2483_v11 = vsel %vm3849_vm7, %v3063_v31, %v2482_v0  ;;  %v2489_v15 = vrot.slane %v4303_v12, 5  ;;  %v4496_v0 = vld [vmem:[%s4568_s2] ss:$0 sm:$0xff] }
  0xa9   : > { %v1362_v44 = vrot.slane %v1361_v22, 4  ;;  %v1385_v40 = vor.u32 %v1384_v19, %v1381_v55  ;;  %v1395_v59 = vor.u32 %v1394_v38, %v1390_v10  ;;  %v3064_v30 = vrot.slane %v3056_v47, 9 }
  0xaa   : > { %v2476_v56 = vsel %vm3849_vm7, %v3062_v20, %v2475_v63  ;;  %v2486_v41 = vsel %vm3849_vm7, %v2484_v39, %v2485_v26  ;;  %v2491_v12 = vrot.slane %v2489_v15, 4  ;;  %v2492_v58 = vrot.slane %v4344_v60, 5 }
  0xab   : > { %v1367_v51 = vsel %vm3694_vm4, %v1362_v44, %v1366_v48  ;;  %v3071_v16 = vcombine.low %v2476_v56, %v2479_v28  ;;  %v3072_v49 = vcombine.low %v2483_v11, %v2486_v41  ;;  %v1386_v46 = vrot.slane %v1385_v40, 4 }
  0xac   : > { %v1396_v54 = vrot.slane %v1395_v59, 4  ;;  %v2490_v48 = vsel %vm3849_vm7, %v3064_v30, %v2489_v15  ;;  %v2493_v50 = vsel %vm3849_vm7, %v2491_v12, %v2492_v58 }
  0xad   : > { %3314 = vmatmul.mubr.msk.bf16.vlgmr.msra.gmra.mrb[0].mxu0 %vm445_vm3, %v3067_v43  ;;  %v1372_v43 = vrot.slane %v1371_v7, 4  ;;  %v1391_v60 = vsel %vm3694_vm4, %v1386_v46, %v1390_v10  ;;  %v3073_v29 = vcombine.low %v2490_v48, %v2493_v50 }
  0xae   : > { %3317 = vmatprep.mubr.msk.bf16.mxu0 %vm445_vm3, %v3068_v18  ;;  %v4591_v18 = vld [vmem:[#allocation4_spill] sm:$0xff] }
  0xaf   : > { %3232 = vmatmul.mubr.msk.bf16.gmra.mrb[8].mxu1 %vm445_vm3, %v3531_v37  ;;  %v1398_v4 = vshll.u32 %v4591_v18, 16  ;;  %v1377_v37 = vsel %vm3694_vm4, %v1372_v43, %v1376_v45 }
  0xb0   : > { %3235 = vmatprep.mubr.msk.bf16.mxu1 %vm445_vm3, %v3532_v23  ;;  %v2930_v23 = vcombine.low %v1367_v51, %v1377_v37 }
  0xb1   : > { %v1400_v62 = vrot.slane %v1398_v4, 5 }
  0xb3   : > { %v1401_v17 = vsel %vm3694_vm4, %v1396_v54, %v1400_v62 }
  0xb4   : > { %v2931_v35 = vcombine.low %v1391_v60, %v1401_v17 }
  0xb5   : > { %3318 = vmatmul.mubr.msk.bf16.gmra.mrb[4].mxu0 %vm445_vm3, %v3069_v42 }
  0xb6   : > { %3321 = vmatprep.mubr.msk.bf16.mxu0 %vm445_vm3, %v3070_v36 }
  0xb7   : > { %3236 = vmatmul.mubr.msk.bf16.gmra.mrb[12].mxu1 %vm445_vm3, %v3533_v52 }
  0xb8   : > { %3249 = vmatprep.mubr.msk.bf16.mxu1 %vm445_vm3, %v2928_v21 }
  0xbd   : > { %3322 = vmatmul.mubr.msk.bf16.gmra.mrb[8].mxu0 %vm445_vm3, %v3071_v16 }
  0xbe   : > { %3325 = vmatprep.mubr.msk.bf16.mxu0 %vm445_vm3, %v3072_v49 }
  0xbf   : > { %3250 = vmatmul.mubr.msk.bf16.vlgmr.msra.gmra.mrb[8].mxu1 %vm445_vm3, %v4397_v3 }
  0xc0   : > { %3253 = vmatprep.mubr.msk.bf16.mxu1 %vm445_vm3, %v2930_v23 }
  0xc5   : > { %3326 = vmatmul.mubr.msk.bf16.gmra.mrb[12].mxu0 %vm445_vm3, %v3073_v29 }
  0xc7   : > { %3254 = vmatmul.mubr.msk.bf16.gmra.mrb[12].mxu1 %vm445_vm3, %v2931_v35 }
 0x172   : > { %v3225_v3 = vpop.f32.mrb[0].mxu1 }
 0x173   : > { %v1107_v63 = vpop.f32.mrb[1].mxu1 }
 0x174   : > { %v3226_v5 = vpop.f32.mrb[2].mxu1 }
 0x175   : > { %v1110_v14 = vpop.f32.mrb[3].mxu1 }
 0x17a   : > { %v3229_v1 = vpop.f32.mrb[4].mxu1 }
 0x17b   : > { %v1123_v13 = vpop.f32.mrb[5].mxu1 }
 0x17c   : > { %v3230_v24 = vpop.f32.mrb[6].mxu1 }
 0x17d   : > { %v1126_v8 = vpop.f32.mrb[7].mxu1 }
 0x180   : > { %v3315_v32 = vpop.f32.mrb[0].mxu0 }
 0x181   : > { %v3331_v27 = vadd.f32 %v3315_v32, %v3225_v3  ;;  %v2581_v34 = vpop.f32.mrb[1].mxu0 }
 0x182   : > { %v3332_v2 = vadd.f32 %v2581_v34, %v1107_v63  ;;  %v3316_v9 = vpop.f32.mrb[2].mxu0 }
 0x183   : > { %v2669_v61 = vadd.f32 %v3331_v27, %v4496_v0  ;;  %v3333_v6 = vadd.f32 %v3316_v9, %v3226_v5  ;;  %v2584_v42 = vpop.f32.mrb[3].mxu0 }
 0x184   : > { %v2667_v22 = vadd.f32 %v3332_v2, %v4496_v0  ;;  %v3334_v7 = vadd.f32 %v2584_v42, %v1110_v14 }
 0x185   : > { %2686 = vst.msk [vmem:[%s4501_s5 + $0x10] sm:$0xff] %vm2683_vm8, %v2669_v61  ;;  %v2670_v33 = vadd.f32 %v3333_v6, %v4496_v0 }
 0x186   : > { %2684 = vst.msk [vmem:[%s4501_s5] sm:$0xff] %vm2683_vm8, %v2667_v22  ;;  %v2668_v25 = vadd.f32 %v3334_v7, %v4496_v0 }
 0x187   : > { %2687 = vst.msk [vmem:[%s4501_s5 + $0x18] sm:$0xff] %vm2683_vm8, %v2670_v33 }
 0x188   : > { %2685 = vst.msk [vmem:[%s4501_s5 + $0x8] sm:$0xff] %vm2683_vm8, %v2668_v25  ;;  %v3319_v36 = vpop.f32.mrb[4].mxu0 }
 0x189   : > { %v3335_v20 = vadd.f32 %v3319_v36, %v3229_v1  ;;  %v2597_v53 = vpop.f32.mrb[5].mxu0 }
 0x18a   : > { %v3336_v57 = vadd.f32 %v2597_v53, %v1123_v13  ;;  %v3320_v52 = vpop.f32.mrb[6].mxu0 }
 0x18b   : > { %v2673_v21 = vadd.f32 %v3335_v20, %v4496_v0  ;;  %v3337_v31 = vadd.f32 %v3320_v52, %v3230_v24  ;;  %v2600_v39 = vpop.f32.mrb[7].mxu0 }
 0x18c   : > { %v2671_v26 = vadd.f32 %v3336_v57, %v4496_v0  ;;  %v3338_v55 = vadd.f32 %v2600_v39, %v1126_v8 }
 0x18d   : > { %2690 = vst.msk [vmem:[%s4501_s5 + $0x30] sm:$0xff] %vm2683_vm8, %v2673_v21  ;;  %v2674_v19 = vadd.f32 %v3337_v31, %v4496_v0 }
 0x18e   : > { %2688 = vst.msk [vmem:[%s4501_s5 + $0x20] sm:$0xff] %vm2683_vm8, %v2671_v26  ;;  %v2672_v10 = vadd.f32 %v3338_v55, %v4496_v0 }
 0x18f   : > { %2691 = vst.msk [vmem:[%s4501_s5 + $0x38] sm:$0xff] %vm2683_vm8, %v2674_v19 }
 0x190   : > { %2689 = vst.msk [vmem:[%s4501_s5 + $0x28] sm:$0xff] %vm2683_vm8, %v2672_v10  ;;  %v3323_v38 = vpop.f32.mrb[8].mxu0 }
 0x191   : > { %v2613_v43 = vpop.f32.mrb[9].mxu0 }
 0x192   : > { %v3251_v44 = vpop.f32.mrb[8].mxu1  ;;  %v3324_v28 = vpop.f32.mrb[10].mxu0 }
 0x193   : > { %v3339_v45 = vadd.f32 %v3323_v38, %v3251_v44  ;;  %v1521_v56 = vpop.f32.mrb[9].mxu1  ;;  %v2616_v41 = vpop.f32.mrb[11].mxu0 }
 0x194   : > { %v3340_v11 = vadd.f32 %v2613_v43, %v1521_v56  ;;  %v3252_v15 = vpop.f32.mrb[10].mxu1 }
 0x195   : > { %v2677_v40 = vadd.f32 %v3339_v45, %v4496_v0  ;;  %v3341_v59 = vadd.f32 %v3324_v28, %v3252_v15  ;;  %v1524_v18 = vpop.f32.mrb[11].mxu1 }
 0x196   : > { %v2675_v4 = vadd.f32 %v3340_v11, %v4496_v0  ;;  %v3342_v47 = vadd.f32 %v2616_v41, %v1524_v18 }
 0x197   : > { %2694 = vst.msk [vmem:[%s4501_s5 + $0x50] sm:$0xff] %vm2683_vm8, %v2677_v40  ;;  %v2678_v51 = vadd.f32 %v3341_v59, %v4496_v0 }
 0x198   : > { %2692 = vst.msk [vmem:[%s4501_s5 + $0x40] sm:$0xff] %vm2683_vm8, %v2675_v4  ;;  %v2676_v37 = vadd.f32 %v3342_v47, %v4496_v0  ;;  %v3327_v16 = vpop.f32.mrb[12].mxu0 }
 0x199   : > { %2695 = vst.msk [vmem:[%s4501_s5 + $0x58] sm:$0xff] %vm2683_vm8, %v2678_v51  ;;  %v2629_v30 = vpop.f32.mrb[13].mxu0 }
 0x19a   : > { %2693 = vst.msk [vmem:[%s4501_s5 + $0x48] sm:$0xff] %vm2683_vm8, %v2676_v37  ;;  %v3255_v49 = vpop.f32.mrb[12].mxu1  ;;  %v3328_v23 = vpop.f32.mrb[14].mxu0 }
 0x19b   : > { %v3343_v12 = vadd.f32 %v3327_v16, %v3255_v49  ;;  %v1537_v58 = vpop.f32.mrb[13].mxu1  ;;  %v2632_v62 = vpop.f32.mrb[15].mxu0 }
 0x19c   : > { %v3344_v46 = vadd.f32 %v2629_v30, %v1537_v58  ;;  %v3256_v54 = vpop.f32.mrb[14].mxu1 }
 0x19d   : > { %v2681_v48 = vadd.f32 %v3343_v12, %v4496_v0  ;;  %v3345_v50 = vadd.f32 %v3328_v23, %v3256_v54  ;;  %v1540_v60 = vpop.f32.mrb[15].mxu1 }
 0x19e   : > { %v2679_v17 = vadd.f32 %v3344_v46, %v4496_v0  ;;  %v3346_v29 = vadd.f32 %v2632_v62, %v1540_v60 }
 0x19f   : > { %2698 = vst.msk [vmem:[%s4501_s5 + $0x70] sm:$0xff] %vm2683_vm8, %v2681_v48  ;;  %v2682_v35 = vadd.f32 %v3345_v50, %v4496_v0 }
 0x1a0   : > { %2696 = vst.msk [vmem:[%s4501_s5 + $0x60] sm:$0xff] %vm2683_vm8, %v2679_v17  ;;  %v2680_v3 = vadd.f32 %v3346_v29, %v4496_v0 }
 0x1a1   : > { %2699 = vst.msk [vmem:[%s4501_s5 + $0x78] sm:$0xff] %vm2683_vm8, %v2682_v35 }
 0x1a2   : > { %2697 = vst.msk [vmem:[%s4501_s5 + $0x68] sm:$0xff] %vm2683_vm8, %v2680_v3 }
 0x1a3 PF: > { %s13_s16 = sadd.s32 1, %s3573_s16   ;;  %s4592_s12 = smov %s3565_s14 }
 0x1a4   : > { %p10_p7 = scmp.ge.s32.totalorder %s13_s16, 10   ;;  %s4593_s13 = smov %s3569_s15 }
 0x1a5   : > { %s4594_s14 = smov %s4597_s17  ;;  %s4595_s15 = smov %s4601_s18 }
 0x1a6   :  { %12 = sbr.rel (!%p10_p7) target bundleno = 3 (0x3), region = 73 }

</bundles_post_ra>
